<compile_context>
chip_gen: v6e
topology: v6e:2x2x1
jax: 0.10.0
libtpu: 0.0.40
codegen_flags: <defaults>
</compile_context>

<pallas_src>
import functools

import jax
import jax.numpy as jnp
from jax.experimental import pallas as pl
from jax.experimental.pallas import tpu as pltpu


def _round_up(x, m):
    return ((x + m - 1) // m) * m


def _ffn_kernel_resident(x_ref, w1_ref, b1_ref, w2_ref, b2_ref, o_ref):
    # x_ref:  (tm, E) f32     w1_ref: (E, H) bf16   b1_ref: (1, H) f32
    # w2_ref: (H, E) bf16     b2_ref: (1, E) f32    o_ref:  (tm, E) f32
    x = x_ref[...].astype(jnp.bfloat16)               # on-chip cast (VPU)
    h = jnp.dot(x, w1_ref[...],
                preferred_element_type=jnp.float32) + b1_ref[...]
    h = jnp.maximum(h, 0.0)                           # ReLU (f32, VPU)
    y = jnp.dot(h.astype(jnp.bfloat16), w2_ref[...],
                preferred_element_type=jnp.float32) + b2_ref[...]
    # Dropout(p) in eval mode = identity.
    o_ref[...] = y.astype(o_ref.dtype)


def _ffn_kernel_htiled(x_ref, w1_ref, b1_ref, w2_ref, b2_ref, o_ref):
    # Fallback for very large H: reduce over H tiles, accumulating directly
    # into the f32 output block (VMEM-resident across the h axis) -- no scratch.
    h_idx = pl.program_id(1)
    x = x_ref[...].astype(jnp.bfloat16)
    h = jnp.dot(x, w1_ref[...],
                preferred_element_type=jnp.float32) + b1_ref[...]
    h = jnp.maximum(h, 0.0)
    part = jnp.dot(h.astype(jnp.bfloat16), w2_ref[...],
                   preferred_element_type=jnp.float32)

    @pl.when(h_idx == 0)
    def _():
        o_ref[...] = part + b2_ref[...]

    @pl.when(h_idx != 0)
    def _():
        o_ref[...] += part


@functools.partial(jax.jit, static_argnames=("block_m", "block_h"))
def feed_forward(x, w1, b1, w2, b2, *, block_m=256, block_h=512):
    """x: (B, T, E) f32 -> (B, T, E) f32."""
    B, T, E = x.shape
    H = w1.shape[1]
    M = B * T

    # No pad / no bf16 pass over activations in the wrapper: the kernel reads
    # f32 x directly and casts on-chip.  Weights are small; cast them once.
    x2d = x.reshape(M, E).astype(jnp.float32)
    w1b = w1.astype(jnp.bfloat16)
    w2b = w2.astype(jnp.bfloat16)
    b1f = b1.reshape(1, H).astype(jnp.float32)
    b2f = b2.reshape(1, E).astype(jnp.float32)

    # ---- M tile: give both v7x TensorCores work when possible, keep the tile
    # a multiple of 16 (bf16 sublanes; 128/256 preferred for the MXU). --------
    tm = min(block_m, _round_up(max(pl.cdiv(M, 2), 1), 16))
    tm = max(tm, 16)

    weight_bytes = (E * H + H * E) * 2                 # resident bf16 weights
    resident_ok = weight_bytes <= (20 << 20)           # conservative vs v7x 64 MiB

    flops = 4 * M * E * H                              # two matmuls

    if resident_ok:
        # Cap the (tm, H) f32 + bf16 ReLU intermediate at ~8 MiB.
        tm_cap = max(16, ((8 << 20) // (H * 6)) // 16 * 16)
        tm = min(tm, tm_cap)
        grid = (pl.cdiv(M, tm),)

        est_vmem = (2 * (tm * E * 4) * 2               # x / out tiles, dbl-buffered
                    + weight_bytes * 2                 # W1/W2 (allocator 2x)
                    + (H + E) * 4 * 2                  # biases
                    + tm * H * 6)                      # ReLU intermediate + bf16 copy
        vmem_limit = int(min(max(32 << 20, est_vmem * 3 // 2), 56 << 20))

        bytes_accessed = (M * E * 4                    # x read (f32)
                          + M * E * 4                  # out write (f32)
                          + weight_bytes               # weights read once (resident)
                          + (H + E) * 4)               # biases

        out2d = pl.pallas_call(
            _ffn_kernel_resident,
            out_shape=jax.ShapeDtypeStruct((M, E), jnp.float32),
            grid_spec=pltpu.PrefetchScalarGridSpec(
                num_scalar_prefetch=0,
                grid=grid,
                in_specs=[
                    pl.BlockSpec((tm, E), lambda i: (i, 0)),   # x row tile
                    pl.BlockSpec((E, H), lambda i: (0, 0)),    # W1 (resident)
                    pl.BlockSpec((1, H), lambda i: (0, 0)),    # b1 (resident)
                    pl.BlockSpec((H, E), lambda i: (0, 0)),    # W2 (resident)
                    pl.BlockSpec((1, E), lambda i: (0, 0)),    # b2 (resident)
                ],
                out_specs=pl.BlockSpec((tm, E), lambda i: (i, 0)),
            ),
            compiler_params=pltpu.CompilerParams(
                dimension_semantics=("parallel",),
                vmem_limit_bytes=vmem_limit,
            ),
            cost_estimate=pl.CostEstimate(
                flops=flops, transcendentals=0, bytes_accessed=bytes_accessed),
        )(x2d, w1b, b1f, w2b, b2f)
    else:
        # Very large H: tile the reduction.  th must divide H exactly (no
        # ragged reads on the reduction axis), capped by block_h.
        th = min(block_h, H)
        while H % th:
            th -= 1
        num_m = pl.cdiv(M, tm)
        grid = (num_m, H // th)

        est_vmem = (2 * (tm * E * 4) * 2               # x / out tiles
                    + 2 * (E * th + th * E) * 2 * 2    # W1/W2 tiles, dbl-buffered
                    + (th + E) * 4 * 2                 # biases
                    + tm * th * 6)                     # ReLU intermediate + bf16 copy
        vmem_limit = int(min(max(32 << 20, est_vmem * 3 // 2), 56 << 20))

        bytes_accessed = (M * E * 4 + M * E * 4
                          + num_m * weight_bytes       # weights re-read per M tile
                          + (H + E) * 4)

        out2d = pl.pallas_call(
            _ffn_kernel_htiled,
            out_shape=jax.ShapeDtypeStruct((M, E), jnp.float32),
            grid_spec=pltpu.PrefetchScalarGridSpec(
                num_scalar_prefetch=0,
                grid=grid,
                in_specs=[
                    pl.BlockSpec((tm, E), lambda i, h: (i, 0)),   # x row tile
                    pl.BlockSpec((E, th), lambda i, h: (0, h)),   # W1 column block
                    pl.BlockSpec((1, th), lambda i, h: (0, h)),   # b1 chunk
                    pl.BlockSpec((th, E), lambda i, h: (h, 0)),   # W2 row block
                    pl.BlockSpec((1, E), lambda i, h: (0, 0)),    # b2 (constant)
                ],
                out_specs=pl.BlockSpec((tm, E), lambda i, h: (i, 0)),
            ),
            compiler_params=pltpu.CompilerParams(
                dimension_semantics=("parallel", "arbitrary"),
                vmem_limit_bytes=vmem_limit,
            ),
            cost_estimate=pl.CostEstimate(
                flops=flops, transcendentals=0, bytes_accessed=bytes_accessed),
        )(x2d, w1b, b1f, w2b, b2f)

    return out2d.reshape(B, T, E)


def _reference(x, w1, b1, w2, b2):
    h = jnp.maximum(x @ w1 + b1[0], 0.0)
    return h @ w2 + b2[0]


if __name__ == "__main__":
    # Module-consistent shapes: number_of_embeddings=384, hidden=4*384.
    number_of_embeddings = 384
    hidden = 4 * number_of_embeddings
    batch, seq = 2, 8

    key = jax.random.PRNGKey(0)
    kx, k1, k2, k3, k4 = jax.random.split(key, 5)

    x = jax.random.normal(kx, (batch, seq, number_of_embeddings), dtype=jnp.float32)

    # Deterministic parameter init (uniform, ~PyTorch Linear default scale).
    bound1 = 1.0 / (number_of_embeddings ** 0.5)
    bound2 = 1.0 / (hidden ** 0.5)
    w1 = jax.random.uniform(k1, (number_of_embeddings, hidden), jnp.float32,
                            -bound1, bound1)
    b1 = jax.random.uniform(k2, (1, hidden), jnp.float32, -bound1, bound1)
    w2 = jax.random.uniform(k3, (hidden, number_of_embeddings), jnp.float32,
                            -bound2, bound2)
    b2 = jax.random.uniform(k4, (1, number_of_embeddings), jnp.float32,
                            -bound2, bound2)

    out = feed_forward(x, w1, b1, w2, b2)
    out = jax.block_until_ready(out)

    ref = _reference(x, w1, b1, w2, b2)
    assert out.shape == (batch, seq, number_of_embeddings)
    # bf16 matmul operands with f32 accumulation -> loosened tolerance
    # (explicit precision choice for MXU throughput).
    max_err = float(jnp.max(jnp.abs(out - ref)))
    assert jnp.allclose(out, ref, atol=2e-2, rtol=2e-2), max_err

    print("KERNEL_OK")
</pallas_src>

<mosaic_0001>
module attributes {stable_mosaic.version = 11 : i64} {
  func.func @_ffn_kernel_resident(%arg0: i32, %arg1: memref<16x384xf32, #tpu.memory_space<vmem>>, %arg2: memref<384x1536xbf16, #tpu.memory_space<vmem>>, %arg3: memref<1x1536xf32, #tpu.memory_space<vmem>>, %arg4: memref<1536x384xbf16, #tpu.memory_space<vmem>>, %arg5: memref<1x384xf32, #tpu.memory_space<vmem>>, %arg6: memref<16x384xf32, #tpu.memory_space<vmem>>) attributes {dimension_semantics = [#tpu.dimension_semantics<parallel>], iteration_bounds = array<i64: 1>, scalar_prefetch = 0 : i64, scratch_operands = 0 : i64, tpu.core_type = #tpu.core_type<tc>, window_params = [{transform_indices = @transform_0, window_bounds = array<i64: 16, 384>}, {pipeline_mode = #tpu.pipeline_mode<synchronous>, transform_indices = @transform_1, window_bounds = array<i64: 384, 1536>}, {pipeline_mode = #tpu.pipeline_mode<synchronous>, transform_indices = @transform_2, window_bounds = array<i64: 1, 1536>}, {pipeline_mode = #tpu.pipeline_mode<synchronous>, transform_indices = @transform_3, window_bounds = array<i64: 1536, 384>}, {pipeline_mode = #tpu.pipeline_mode<synchronous>, transform_indices = @transform_4, window_bounds = array<i64: 1, 384>}, {transform_indices = @transform_5, window_bounds = array<i64: 16, 384>}]} {
    %c0 = arith.constant 0 : index
    %c0_0 = arith.constant 0 : index
    %0 = vector.load %arg1[%c0, %c0_0] : memref<16x384xf32, #tpu.memory_space<vmem>>, vector<16x384xf32>
    %1 = arith.truncf %0 : vector<16x384xf32> to vector<16x384xbf16>
    %c0_1 = arith.constant 0 : index
    %c0_2 = arith.constant 0 : index
    %2 = vector.load %arg2[%c0_1, %c0_2] : memref<384x1536xbf16, #tpu.memory_space<vmem>>, vector<384x1536xbf16>
    %cst = arith.constant dense<0.000000e+00> : vector<16x1536xf32>
    %3 = tpu.matmul %1, %2, %cst {dimension_numbers = #tpu.dot_dimension_numbers<[1], [0], [0], [1], [0, 0, 1, 1], [], []>} : vector<16x384xbf16>, vector<384x1536xbf16>, vector<16x1536xf32> -> vector<16x1536xf32>
    %c0_3 = arith.constant 0 : index
    %c0_4 = arith.constant 0 : index
    %4 = vector.load %arg3[%c0_3, %c0_4] : memref<1x1536xf32, #tpu.memory_space<vmem>>, vector<1x1536xf32>
    %5 = vector.broadcast %4 : vector<1x1536xf32> to vector<16x1536xf32>
    %6 = arith.addf %3, %5 : vector<16x1536xf32>
    %cst_5 = arith.constant 0.000000e+00 : f32
    %7 = vector.broadcast %cst_5 : f32 to vector<16x1536xf32>
    %8 = arith.maximumf %6, %7 : vector<16x1536xf32>
    %9 = arith.truncf %8 : vector<16x1536xf32> to vector<16x1536xbf16>
    %c0_6 = arith.constant 0 : index
    %c0_7 = arith.constant 0 : index
    %10 = vector.load %arg4[%c0_6, %c0_7] : memref<1536x384xbf16, #tpu.memory_space<vmem>>, vector<1536x384xbf16>
    %cst_8 = arith.constant dense<0.000000e+00> : vector<16x384xf32>
    %11 = tpu.matmul %9, %10, %cst_8 {dimension_numbers = #tpu.dot_dimension_numbers<[1], [0], [0], [1], [0, 0, 1, 1], [], []>} : vector<16x1536xbf16>, vector<1536x384xbf16>, vector<16x384xf32> -> vector<16x384xf32>
    %c0_9 = arith.constant 0 : index
    %c0_10 = arith.constant 0 : index
    %12 = vector.load %arg5[%c0_9, %c0_10] : memref<1x384xf32, #tpu.memory_space<vmem>>, vector<1x384xf32>
    %13 = vector.broadcast %12 : vector<1x384xf32> to vector<16x384xf32>
    %14 = arith.addf %11, %13 : vector<16x384xf32>
    %c0_11 = arith.constant 0 : index
    %c0_12 = arith.constant 0 : index
    %15 = vector.load %arg6[%c0_11, %c0_12] : memref<16x384xf32, #tpu.memory_space<vmem>>, vector<16x384xf32>
    tpu.vector_store %arg6[%c0_11, %c0_12], %14 {strides = array<i32>} : memref<16x384xf32, #tpu.memory_space<vmem>>, vector<16x384xf32>,
    return
  }
  func.func @transform_0(%arg0: i32) -> (i32, i32) {
    %c0_i32 = arith.constant 0 : i32
    %c0_i32_0 = arith.constant 0 : i32
    return %arg0, %c0_i32 : i32, i32
  }
  func.func @transform_1(%arg0: i32) -> (i32, i32) {
    %c0_i32 = arith.constant 0 : i32
    %c0_i32_0 = arith.constant 0 : i32
    %c0_i32_1 = arith.constant 0 : i32
    return %c0_i32, %c0_i32_0 : i32, i32
  }
  func.func @transform_2(%arg0: i32) -> (i32, i32) {
    %c0_i32 = arith.constant 0 : i32
    %c0_i32_0 = arith.constant 0 : i32
    %c0_i32_1 = arith.constant 0 : i32
    return %c0_i32, %c0_i32_0 : i32, i32
  }
  func.func @transform_3(%arg0: i32) -> (i32, i32) {
    %c0_i32 = arith.constant 0 : i32
    %c0_i32_0 = arith.constant 0 : i32
    %c0_i32_1 = arith.constant 0 : i32
    return %c0_i32, %c0_i32_0 : i32, i32
  }
  func.func @transform_4(%arg0: i32) -> (i32, i32) {
    %c0_i32 = arith.constant 0 : i32
    %c0_i32_0 = arith.constant 0 : i32
    %c0_i32_1 = arith.constant 0 : i32
    return %c0_i32, %c0_i32_0 : i32, i32
  }
  func.func @transform_5(%arg0: i32) -> (i32, i32) {
    %c0_i32 = arith.constant 0 : i32
    %c0_i32_0 = arith.constant 0 : i32
    return %arg0, %c0_i32 : i32, i32
  }
}

</mosaic_0001>

<bundles_post_ra>
// kernel: feed_forward.1
= control target key start
LH: loop header
LB: loop body
LE: loop exit
PB: predicated region body
PF: predicated region fallthrough
CT: control target
= control target key end

     0   :  { %v6389_v2 = vmov 0   ;;  %s8342_s0 = inlined_call_operand.vmem [shape: f32[16,384], index: 0, kind: input, shape index: {}]   ;;  %s8343_s1 = inlined_call_operand.vmem [shape: bf16[384,1536], index: 1, kind: input, shape index: {}]   ;;  %s8344_s2 = inlined_call_operand.vmem [shape: f32[1,1536], index: 2, kind: input, shape index: {}]   ;;  %s8345_s3 = inlined_call_operand.vmem [shape: bf16[1536,384], index: 3, kind: input, shape index: {}]   ;;  %s8346_s4 = inlined_call_operand.vmem [shape: f32[1,384], index: 4, kind: input, shape index: {}]   ;;  %s8347_s5 = inlined_call_operand.hbm [shape: f32[16,384], index: 5, kind: output, shape index: {}]  }
   0x1   :  { %v5550_v0 = vld [vmem:[%s8343_s1 + $0x2a4] ss:$48 sps:$4 sm:$0xff]   ;;  %1898 = vmatprep.mubr.bf16.mxu1 %v6389_v2  ;;  %v5554_v3 = vld [vmem:[%s8343_s1 + $0x2a0] ss:$48 sps:$4 sm:$0xff]   ;;  %v27_v34 = vld [vmem:[%s8342_s0 + $0x28] sm:$0xff] }
   0x2   :  { %v5552_v1 = vld [vmem:[%s8343_s1 + $0x8a4] ss:$48 sps:$4 sm:$0xff]   ;;  %1823 = vmatprep.subr.bf16.mxu0 %v5550_v0  ;;  %v5555_v4 = vld [vmem:[%s8343_s1 + $0x8a0] ss:$48 sps:$4 sm:$0xff]   ;;  %v5602_v36 = vld [vmem:[%s8343_s1 + $0x2ac] ss:$48 sps:$4 sm:$0xff]  }
   0x3   :  { %1866 = vmatprep.subr.bf16.mxu1 %v5552_v1  ;;  %v5556_v5 = vld [vmem:[%s8343_s1 + $0x244] ss:$48 sps:$4 sm:$0xff]   ;;  %1824 = vmatpush1.bf16.msra.mxu0 %v5554_v3  ;;  %v5560_v7 = vld [vmem:[%s8343_s1 + $0x240] ss:$48 sps:$4 sm:$0xff]   ;;  %v5600_v38 = vld [vmem:[%s8343_s1 + $0x2a8] ss:$48 sps:$4 sm:$0xff]  }
   0x4   :  { %1867 = vmatpush1.bf16.msra.mxu1 %v5555_v4  ;;  %v5558_v6 = vld [vmem:[%s8343_s1 + $0x844] ss:$48 sps:$4 sm:$0xff]   ;;  %1825 = vmatprep.subr.bf16.mxu0 %v5556_v5  ;;  %v5561_v8 = vld [vmem:[%s8343_s1 + $0x840] ss:$48 sps:$4 sm:$0xff]   ;;  %v5608_v41 = vld [vmem:[%s8343_s1 + $0x24c] ss:$48 sps:$4 sm:$0xff]  }
   0x5   :  { %1868 = vmatprep.subr.bf16.mxu1 %v5558_v6  ;;  %v5562_v9 = vld [vmem:[%s8343_s1 + $0x1e4] ss:$48 sps:$4 sm:$0xff]   ;;  %v5566_v11 = vld [vmem:[%s8343_s1 + $0x1e0] ss:$48 sps:$4 sm:$0xff]   ;;  %v5606_v42 = vld [vmem:[%s8343_s1 + $0x248] ss:$48 sps:$4 sm:$0xff]  }
   0x6   :  { %v5564_v10 = vld [vmem:[%s8343_s1 + $0x7e4] ss:$48 sps:$4 sm:$0xff]   ;;  %v5567_v12 = vld [vmem:[%s8343_s1 + $0x7e0] ss:$48 sps:$4 sm:$0xff]   ;;  %v5614_v45 = vld [vmem:[%s8343_s1 + $0x1ec] ss:$48 sps:$4 sm:$0xff]  }
   0x7   :  { %1826 = vmatpush1.bf16.msra.mxu0 %v5560_v7  ;;  %v5568_v13 = vld [vmem:[%s8343_s1 + $0x184] ss:$48 sps:$4 sm:$0xff]   ;;  %v5572_v15 = vld [vmem:[%s8343_s1 + $0x180] ss:$48 sps:$4 sm:$0xff]   ;;  %v5612_v46 = vld [vmem:[%s8343_s1 + $0x1e8] ss:$48 sps:$4 sm:$0xff]  }
   0x8   :  { %1869 = vmatpush1.bf16.msra.mxu1 %v5561_v8  ;;  %1827 = vmatprep.subr.bf16.mxu0 %v5562_v9  ;;  %v5570_v14 = vld [vmem:[%s8343_s1 + $0x784] ss:$48 sps:$4 sm:$0xff]   ;;  %v5573_v16 = vld [vmem:[%s8343_s1 + $0x780] ss:$48 sps:$4 sm:$0xff]   ;;  %v5620_v49 = vld [vmem:[%s8343_s1 + $0x18c] ss:$48 sps:$4 sm:$0xff]  }
   0x9   :  { %1870 = vmatprep.subr.bf16.mxu1 %v5564_v10  ;;  %v5574_v17 = vld [vmem:[%s8343_s1 + $0x124] ss:$48 sps:$4 sm:$0xff]   ;;  %v5578_v19 = vld [vmem:[%s8343_s1 + $0x120] ss:$48 sps:$4 sm:$0xff]   ;;  %v23_v50 = vld [vmem:[%s8342_s0 + $0x8] sm:$0xff] }
   0xa   :  { %v5576_v18 = vld [vmem:[%s8343_s1 + $0x724] ss:$48 sps:$4 sm:$0xff]   ;;  %v5579_v20 = vld [vmem:[%s8343_s1 + $0x720] ss:$48 sps:$4 sm:$0xff]   ;;  %v5618_v52 = vld [vmem:[%s8343_s1 + $0x188] ss:$48 sps:$4 sm:$0xff]  }
   0xb   :  { %1828 = vmatpush1.bf16.msra.mxu0 %v5566_v11  ;;  %v5580_v21 = vld [vmem:[%s8343_s1 + $0xc4] ss:$48 sps:$4 sm:$0xff]   ;;  %v5584_v23 = vld [vmem:[%s8343_s1 + $0xc0] ss:$48 sps:$4 sm:$0xff]   ;;  %v5626_v56 = vld [vmem:[%s8343_s1 + $0x12c] ss:$48 sps:$4 sm:$0xff]  }
   0xc   :  { %1871 = vmatpush1.bf16.msra.mxu1 %v5567_v12  ;;  %1829 = vmatprep.subr.bf16.mxu0 %v5568_v13  ;;  %v5582_v22 = vld [vmem:[%s8343_s1 + $0x6c4] ss:$48 sps:$4 sm:$0xff]   ;;  %v5585_v24 = vld [vmem:[%s8343_s1 + $0x6c0] ss:$48 sps:$4 sm:$0xff]   ;;  %v5624_v57 = vld [vmem:[%s8343_s1 + $0x128] ss:$48 sps:$4 sm:$0xff]  }
   0xd   :  { %1872 = vmatprep.subr.bf16.mxu1 %v5570_v14  ;;  %v5586_v25 = vld [vmem:[%s8343_s1 + $0x64] ss:$48 sps:$4 sm:$0xff]   ;;  %v5590_v27 = vld [vmem:[%s8343_s1 + $0x60] ss:$48 sps:$4 sm:$0xff]   ;;  %v5632_v60 = vld [vmem:[%s8343_s1 + $0xcc] ss:$48 sps:$4 sm:$0xff]  }
   0xe   :  { %v5588_v26 = vld [vmem:[%s8343_s1 + $0x664] ss:$48 sps:$4 sm:$0xff]   ;;  %v5591_v28 = vld [vmem:[%s8343_s1 + $0x660] ss:$48 sps:$4 sm:$0xff]   ;;  %v5630_v61 = vld [vmem:[%s8343_s1 + $0xc8] ss:$48 sps:$4 sm:$0xff]  }
   0xf   :  { %1830 = vmatpush1.bf16.msra.mxu0 %v5572_v15  ;;  %v5592_v29 = vld [vmem:[%s8343_s1 + $0x4] ss:$48 sps:$4 sm:$0xff]   ;;  %v5596_v31 = vld [vmem:[%s8343_s1] ss:$48 sps:$4 sm:$0xff]   ;;  %v5638_v0 = vld [vmem:[%s8343_s1 + $0x6c] ss:$48 sps:$4 sm:$0xff]  }
  0x10   :  { %1873 = vmatpush1.bf16.msra.mxu1 %v5573_v16  ;;  %1831 = vmatprep.subr.bf16.mxu0 %v5574_v17  ;;  %v5594_v30 = vld [vmem:[%s8343_s1 + $0x604] ss:$48 sps:$4 sm:$0xff]   ;;  %v5597_v32 = vld [vmem:[%s8343_s1 + $0x600] ss:$48 sps:$4 sm:$0xff]   ;;  %v5636_v1 = vld [vmem:[%s8343_s1 + $0x68] ss:$48 sps:$4 sm:$0xff]  }
  0x11   :  { %1874 = vmatprep.subr.bf16.mxu1 %v5576_v18  ;;  %v24_v33 = vld [vmem:[%s8342_s0 + $0x10] sm:$0xff]  ;;  %v26_v51 = vld [vmem:[%s8342_s0 + $0x20] sm:$0xff]  ;;  %v5644_v5 = vld [vmem:[%s8343_s1 + $0xc] ss:$48 sps:$4 sm:$0xff]  }
  0x12   :  { %v5598_v35 = vld [vmem:[%s8343_s1 + $0x5a4] ss:$48 sps:$4 sm:$0xff]   ;;  %v6532_v37 = vpack.c.bf16 %v27_v34, %v24_v33  ;;  %v5603_v39 = vld [vmem:[%s8343_s1 + $0x5a0] ss:$48 sps:$4 sm:$0xff]   ;;  %v6583_v54 = vpack.c.bf16 %v26_v51, %v23_v50  ;;  %v5642_v6 = vld [vmem:[%s8343_s1 + $0x8] ss:$48 sps:$4 sm:$0xff]  }
  0x13   :  { %1832 = vmatpush1.bf16.msra.mxu0 %v5578_v19  ;;  %v5604_v40 = vld [vmem:[%s8343_s1 + $0x544] ss:$48 sps:$4 sm:$0xff]   ;;  %v5609_v43 = vld [vmem:[%s8343_s1 + $0x540] ss:$48 sps:$4 sm:$0xff]   ;;  %v25_v9 = vld [vmem:[%s8342_s0 + $0x18] sm:$0xff] }
  0x14   :  { %1875 = vmatpush1.bf16.msra.mxu1 %v5579_v20  ;;  %1833 = vmatprep.subr.bf16.mxu0 %v5580_v21  ;;  %v5610_v44 = vld [vmem:[%s8343_s1 + $0x4e4] ss:$48 sps:$4 sm:$0xff]   ;;  %v5615_v47 = vld [vmem:[%s8343_s1 + $0x4e0] ss:$48 sps:$4 sm:$0xff]   ;;  %v5648_v10 = vld [vmem:[%s8343_s1 + $0x5ac] ss:$48 sps:$4 sm:$0xff]  }
  0x15   :  { %1876 = vmatprep.subr.bf16.mxu1 %v5582_v22  ;;  %v5616_v48 = vld [vmem:[%s8343_s1 + $0x484] ss:$48 sps:$4 sm:$0xff]   ;;  %v5621_v53 = vld [vmem:[%s8343_s1 + $0x480] ss:$48 sps:$4 sm:$0xff]   ;;  %1855 = vmatprep.mubr.bf16.mxu0 %v6583_v54  ;;  %v5651_v11 = vld [vmem:[%s8343_s1 + $0x8ac] ss:$48 sps:$4 sm:$0xff]  }
  0x16   :  { %v5622_v55 = vld [vmem:[%s8343_s1 + $0x424] ss:$48 sps:$4 sm:$0xff]   ;;  %v5627_v58 = vld [vmem:[%s8343_s1 + $0x420] ss:$48 sps:$4 sm:$0xff]   ;;  %v5646_v13 = vld [vmem:[%s8343_s1 + $0x5a8] ss:$48 sps:$4 sm:$0xff]  }
  0x17   :  { %1834 = vmatpush1.bf16.msra.mxu0 %v5584_v23  ;;  %v5628_v59 = vld [vmem:[%s8343_s1 + $0x3c4] ss:$48 sps:$4 sm:$0xff]   ;;  %v5633_v62 = vld [vmem:[%s8343_s1 + $0x3c0] ss:$48 sps:$4 sm:$0xff]   ;;  %v5649_v14 = vld [vmem:[%s8343_s1 + $0x8a8] ss:$48 sps:$4 sm:$0xff]  }
  0x18   :  { %1877 = vmatpush1.bf16.msra.mxu1 %v5585_v24  ;;  %1835 = vmatprep.subr.bf16.mxu0 %v5586_v25  ;;  %v5634_v63 = vld [vmem:[%s8343_s1 + $0x364] ss:$48 sps:$4 sm:$0xff]   ;;  %v5639_v3 = vld [vmem:[%s8343_s1 + $0x360] ss:$48 sps:$4 sm:$0xff]   ;;  %v5654_v15 = vld [vmem:[%s8343_s1 + $0x54c] ss:$48 sps:$4 sm:$0xff]  }
  0x19   :  { %1878 = vmatprep.subr.bf16.mxu1 %v5588_v26  ;;  %v5640_v4 = vld [vmem:[%s8343_s1 + $0x304] ss:$48 sps:$4 sm:$0xff]   ;;  %v5645_v7 = vld [vmem:[%s8343_s1 + $0x300] ss:$48 sps:$4 sm:$0xff]   ;;  %v5657_v16 = vld [vmem:[%s8343_s1 + $0x84c] ss:$48 sps:$4 sm:$0xff]  }
  0x1a   :  { %v22_v8 = vld [vmem:[%s8342_s0] sm:$0xff]  ;;  %v5652_v17 = vld [vmem:[%s8343_s1 + $0x548] ss:$48 sps:$4 sm:$0xff]   ;;  %v5660_v19 = vld [vmem:[%s8343_s1 + $0x4ec] ss:$48 sps:$4 sm:$0xff]  }
  0x1b   :  { %1836 = vmatpush1.bf16.msra.mxu0 %v5590_v27  ;;  %v6647_v12 = vpack.c.bf16 %v25_v9, %v22_v8  ;;  %v5655_v18 = vld [vmem:[%s8343_s1 + $0x848] ss:$48 sps:$4 sm:$0xff]   ;;  %v5663_v20 = vld [vmem:[%s8343_s1 + $0x7ec] ss:$48 sps:$4 sm:$0xff]   ;;  %v5700_v50 = vld [vmem:[%s8343_s1 + $0x250] ss:$48 sps:$4 sm:$0xff]  }
  0x1c   :  { %1879 = vmatpush1.bf16.msra.mxu1 %v5591_v28  ;;  %1837 = vmatprep.subr.bf16.mxu0 %v5592_v29  ;;  %v5658_v21 = vld [vmem:[%s8343_s1 + $0x4e8] ss:$48 sps:$4 sm:$0xff]   ;;  %v5666_v23 = vld [vmem:[%s8343_s1 + $0x48c] ss:$48 sps:$4 sm:$0xff]   ;;  %v5703_v51 = vld [vmem:[%s8343_s1 + $0x850] ss:$48 sps:$4 sm:$0xff]  }
  0x1d   :  { %1880 = vmatprep.subr.bf16.mxu1 %v5594_v30  ;;  %v5661_v22 = vld [vmem:[%s8343_s1 + $0x7e8] ss:$48 sps:$4 sm:$0xff]   ;;  %v5669_v24 = vld [vmem:[%s8343_s1 + $0x78c] ss:$48 sps:$4 sm:$0xff]   ;;  %v5730_v8 = vld [vmem:[%s8343_s1 + $0x70] ss:$48 sps:$4 sm:$0xff]  }
  0x1e   :  { %v5664_v25 = vld [vmem:[%s8343_s1 + $0x488] ss:$48 sps:$4 sm:$0xff]   ;;  %v5672_v27 = vld [vmem:[%s8343_s1 + $0x42c] ss:$48 sps:$4 sm:$0xff]   ;;  %v5733_v9 = vld [vmem:[%s8343_s1 + $0x670] ss:$48 sps:$4 sm:$0xff]  }
  0x1f   :  { %1838 = vmatpush1.bf16.msra.mxu0 %v5596_v31  ;;  %v5667_v26 = vld [vmem:[%s8343_s1 + $0x788] ss:$48 sps:$4 sm:$0xff]   ;;  %v5675_v28 = vld [vmem:[%s8343_s1 + $0x72c] ss:$48 sps:$4 sm:$0xff]  }
  0x20   :  { %1881 = vmatpush1.bf16.msra.mxu1 %v5597_v32  ;;  %1839 = vmatprep.subr.bf16.mxu0 %v5598_v35  ;;  %v5670_v29 = vld [vmem:[%s8343_s1 + $0x428] ss:$48 sps:$4 sm:$0xff]   ;;  %v5678_v31 = vld [vmem:[%s8343_s1 + $0x3cc] ss:$48 sps:$4 sm:$0xff]  }
  0x21   :  { %1909 = vmatprep.subr.bf16.mxu1 %v5602_v36  ;;  %v5673_v30 = vld [vmem:[%s8343_s1 + $0x728] ss:$48 sps:$4 sm:$0xff]   ;;  %v5681_v32 = vld [vmem:[%s8343_s1 + $0x6cc] ss:$48 sps:$4 sm:$0xff]  }
  0x22   :  { %v5676_v33 = vld [vmem:[%s8343_s1 + $0x3c8] ss:$48 sps:$4 sm:$0xff]   ;;  %v5684_v35 = vld [vmem:[%s8343_s1 + $0x36c] ss:$48 sps:$4 sm:$0xff]  }
  0x23   :  { %1899 = vmatmul.mubr.bf16.vlgmr.msra.gmra.mxu1 %v6532_v37  ;;  %1840 = vmatpush2.bf16.msra.mxu0 %v5603_v39  ;;  %v5679_v34 = vld [vmem:[%s8343_s1 + $0x6c8] ss:$48 sps:$4 sm:$0xff]   ;;  %v5687_v36 = vld [vmem:[%s8343_s1 + $0x66c] ss:$48 sps:$4 sm:$0xff]  }
  0x24   :  { %1910 = vmatpush1.bf16.msra.mxu1 %v5600_v38  ;;  %1841 = vmatprep.subr.bf16.mxu0 %v5604_v40  ;;  %v5682_v38 = vld [vmem:[%s8343_s1 + $0x368] ss:$48 sps:$4 sm:$0xff]   ;;  %v5690_v40 = vld [vmem:[%s8343_s1 + $0x30c] ss:$48 sps:$4 sm:$0xff]  }
  0x25   :  { %1911 = vmatprep.subr.bf16.mxu1 %v5608_v41  ;;  %1941 = vmatprep.mubr.bf16.mxu1 %v6583_v54  ;;  %v5685_v39 = vld [vmem:[%s8343_s1 + $0x668] ss:$48 sps:$4 sm:$0xff]   ;;  %v5693_v41 = vld [vmem:[%s8343_s1 + $0x60c] ss:$48 sps:$4 sm:$0xff]  }
  0x27   :  { %1842 = vmatpush2.bf16.msra.mxu0 %v5609_v43  ;;  %v5691_v43 = vld [vmem:[%s8343_s1 + $0x608] ss:$48 sps:$4 sm:$0xff]  }
  0x28   :  { %1912 = vmatpush1.bf16.msra.mxu1 %v5606_v42  ;;  %1843 = vmatprep.subr.bf16.mxu0 %v5610_v44  ;;  %v5688_v42 = vld [vmem:[%s8343_s1 + $0x308] ss:$48 sps:$4 sm:$0xff]   ;;  %v5696_v44 = vld [vmem:[%s8343_s1 + $0x2b4] ss:$48 sps:$4 sm:$0xff]  }
  0x29   :  { %1913 = vmatprep.subr.bf16.mxu1 %v5614_v45  ;;  %v5699_v45 = vld [vmem:[%s8343_s1 + $0x8b4] ss:$48 sps:$4 sm:$0xff]  }
  0x2b   :  { %1844 = vmatpush2.bf16.msra.mxu0 %v5615_v47  ;;  %v5697_v47 = vld [vmem:[%s8343_s1 + $0x8b0] ss:$48 sps:$4 sm:$0xff]  }
  0x2c   :  { %1914 = vmatpush1.bf16.msra.mxu1 %v5612_v46  ;;  %1845 = vmatprep.subr.bf16.mxu0 %v5616_v48  ;;  %v5694_v46 = vld [vmem:[%s8343_s1 + $0x2b0] ss:$48 sps:$4 sm:$0xff]   ;;  %v5702_v48 = vld [vmem:[%s8343_s1 + $0x254] ss:$48 sps:$4 sm:$0xff]  }
  0x2d   :  { %1915 = vmatprep.subr.bf16.mxu1 %v5620_v49  ;;  %v5705_v49 = vld [vmem:[%s8343_s1 + $0x854] ss:$48 sps:$4 sm:$0xff]  }
  0x2f   :  { %1846 = vmatpush2.bf16.msra.mxu0 %v5621_v53  ;;  %v5711_v53 = vld [vmem:[%s8343_s1 + $0x7f4] ss:$48 sps:$4 sm:$0xff]  }
  0x30   :  { %1916 = vmatpush1.bf16.msra.mxu1 %v5618_v52  ;;  %1847 = vmatprep.subr.bf16.mxu0 %v5622_v55  ;;  %v5708_v52 = vld [vmem:[%s8343_s1 + $0x1f4] ss:$48 sps:$4 sm:$0xff]   ;;  %v5706_v55 = vld [vmem:[%s8343_s1 + $0x1f0] ss:$48 sps:$4 sm:$0xff]  }
  0x31   :  { %1917 = vmatprep.subr.bf16.mxu1 %v5626_v56  ;;  %v5709_v56 = vld [vmem:[%s8343_s1 + $0x7f0] ss:$48 sps:$4 sm:$0xff]  }
  0x33   :  { %1848 = vmatpush2.bf16.msra.mxu0 %v5627_v58  ;;  %v5717_v58 = vld [vmem:[%s8343_s1 + $0x794] ss:$48 sps:$4 sm:$0xff]  }
  0x34   :  { %1918 = vmatpush1.bf16.msra.mxu1 %v5624_v57  ;;  %1849 = vmatprep.subr.bf16.mxu0 %v5628_v59  ;;  %v5714_v57 = vld [vmem:[%s8343_s1 + $0x194] ss:$48 sps:$4 sm:$0xff]   ;;  %v5712_v59 = vld [vmem:[%s8343_s1 + $0x190] ss:$48 sps:$4 sm:$0xff]  }
  0x35   :  { %1919 = vmatprep.subr.bf16.mxu1 %v5632_v60  ;;  %v5715_v60 = vld [vmem:[%s8343_s1 + $0x790] ss:$48 sps:$4 sm:$0xff]  }
  0x37   :  { %1850 = vmatpush2.bf16.msra.mxu0 %v5633_v62  ;;  %v5723_v62 = vld [vmem:[%s8343_s1 + $0x734] ss:$48 sps:$4 sm:$0xff]  }
  0x38   :  { %1920 = vmatpush1.bf16.msra.mxu1 %v5630_v61  ;;  %1851 = vmatprep.subr.bf16.mxu0 %v5634_v63  ;;  %v5720_v61 = vld [vmem:[%s8343_s1 + $0x134] ss:$48 sps:$4 sm:$0xff]   ;;  %v5718_v63 = vld [vmem:[%s8343_s1 + $0x130] ss:$48 sps:$4 sm:$0xff]  }
  0x39   :  { %1921 = vmatprep.subr.bf16.mxu1 %v5638_v0  ;;  %v5721_v0 = vld [vmem:[%s8343_s1 + $0x730] ss:$48 sps:$4 sm:$0xff]  }
  0x3b   :  { %1852 = vmatpush2.bf16.msra.mxu0 %v5639_v3  ;;  %v5729_v3 = vld [vmem:[%s8343_s1 + $0x6d4] ss:$48 sps:$4 sm:$0xff]  }
  0x3c   :  { %1922 = vmatpush1.bf16.msra.mxu1 %v5636_v1  ;;  %1853 = vmatprep.subr.bf16.mxu0 %v5640_v4  ;;  %v5726_v1 = vld [vmem:[%s8343_s1 + $0xd4] ss:$48 sps:$4 sm:$0xff]   ;;  %v5724_v4 = vld [vmem:[%s8343_s1 + $0xd0] ss:$48 sps:$4 sm:$0xff]  }
  0x3d   :  { %1923 = vmatprep.subr.bf16.mxu1 %v5644_v5  ;;  %v5727_v5 = vld [vmem:[%s8343_s1 + $0x6d0] ss:$48 sps:$4 sm:$0xff]  }
  0x3f   :  { %1854 = vmatpush2.bf16.msra.mxu0 %v5645_v7  ;;  %v5735_v7 = vld [vmem:[%s8343_s1 + $0x674] ss:$48 sps:$4 sm:$0xff]  }
  0x40   :  { %1924 = vmatpush1.bf16.msra.mxu1 %v5642_v6  ;;  %1952 = vmatprep.subr.bf16.mxu0 %v5651_v11  ;;  %v5732_v6 = vld [vmem:[%s8343_s1 + $0x74] ss:$48 sps:$4 sm:$0xff]  }
  0x41   :  { %1925 = vmatprep.subr.bf16.mxu1 %v5648_v10  ;;  %v5738_v10 = vld [vmem:[%s8343_s1 + $0x14] ss:$48 sps:$4 sm:$0xff]  }
  0x42   :  { %1856 = vmatmul.mubr.bf16.vlgmr.msra.gmra.mxu0 %v6647_v12  ;;  %v5741_v11 = vld [vmem:[%s8343_s1 + $0x614] ss:$48 sps:$4 sm:$0xff]  }
  0x43   :  { %1953 = vmatpush1.bf16.msra.mxu0 %v5649_v14  ;;  %1984 = vmatprep.mubr.bf16.mxu0 %v6389_v2  ;;  %v5739_v14 = vld [vmem:[%s8343_s1 + $0x610] ss:$48 sps:$4 sm:$0xff]  }
  0x44   :  { %1926 = vmatpush2.bf16.msra.mxu1 %v5646_v13  ;;  %1954 = vmatprep.subr.bf16.mxu0 %v5657_v16  ;;  %v5736_v13 = vld [vmem:[%s8343_s1 + $0x10] ss:$48 sps:$4 sm:$0xff]   ;;  %v5747_v16 = vld [vmem:[%s8343_s1 + $0x2bc] ss:$48 sps:$4 sm:$0xff]  }
  0x45   :  { %1927 = vmatprep.subr.bf16.mxu1 %v5654_v15  ;;  %v5744_v15 = vld [vmem:[%s8343_s1 + $0x5b4] ss:$48 sps:$4 sm:$0xff]  }
  0x47   :  { %1955 = vmatpush1.bf16.msra.mxu0 %v5655_v18  ;;  %v5745_v18 = vld [vmem:[%s8343_s1 + $0x2b8] ss:$48 sps:$4 sm:$0xff]  }
  0x48   :  { %1928 = vmatpush2.bf16.msra.mxu1 %v5652_v17  ;;  %1956 = vmatprep.subr.bf16.mxu0 %v5663_v20  ;;  %v5742_v17 = vld [vmem:[%s8343_s1 + $0x5b0] ss:$48 sps:$4 sm:$0xff]   ;;  %v5753_v20 = vld [vmem:[%s8343_s1 + $0x25c] ss:$48 sps:$4 sm:$0xff]  }
  0x49   :  { %1929 = vmatprep.subr.bf16.mxu1 %v5660_v19  ;;  %v5750_v19 = vld [vmem:[%s8343_s1 + $0x554] ss:$48 sps:$4 sm:$0xff]  }
  0x4b   :  { %1957 = vmatpush1.bf16.msra.mxu0 %v5661_v22  ;;  %v5751_v22 = vld [vmem:[%s8343_s1 + $0x258] ss:$48 sps:$4 sm:$0xff]  }
  0x4c   :  { %1930 = vmatpush2.bf16.msra.mxu1 %v5658_v21  ;;  %1958 = vmatprep.subr.bf16.mxu0 %v5669_v24  ;;  %v5748_v21 = vld [vmem:[%s8343_s1 + $0x550] ss:$48 sps:$4 sm:$0xff]   ;;  %v5759_v24 = vld [vmem:[%s8343_s1 + $0x1fc] ss:$48 sps:$4 sm:$0xff]  }
  0x4d   :  { %1931 = vmatprep.subr.bf16.mxu1 %v5666_v23  ;;  %v5756_v23 = vld [vmem:[%s8343_s1 + $0x4f4] ss:$48 sps:$4 sm:$0xff]  }
  0x4f   :  { %1959 = vmatpush1.bf16.msra.mxu0 %v5667_v26  ;;  %v5757_v26 = vld [vmem:[%s8343_s1 + $0x1f8] ss:$48 sps:$4 sm:$0xff]  }
  0x50   :  { %1932 = vmatpush2.bf16.msra.mxu1 %v5664_v25  ;;  %1960 = vmatprep.subr.bf16.mxu0 %v5675_v28  ;;  %v5754_v25 = vld [vmem:[%s8343_s1 + $0x4f0] ss:$48 sps:$4 sm:$0xff]   ;;  %v5765_v28 = vld [vmem:[%s8343_s1 + $0x19c] ss:$48 sps:$4 sm:$0xff]  }
  0x51   :  { %1933 = vmatprep.subr.bf16.mxu1 %v5672_v27  ;;  %v5762_v27 = vld [vmem:[%s8343_s1 + $0x494] ss:$48 sps:$4 sm:$0xff]  }
  0x53   :  { %1961 = vmatpush1.bf16.msra.mxu0 %v5673_v30  ;;  %v5763_v30 = vld [vmem:[%s8343_s1 + $0x198] ss:$48 sps:$4 sm:$0xff]  }
  0x54   :  { %1934 = vmatpush2.bf16.msra.mxu1 %v5670_v29  ;;  %1962 = vmatprep.subr.bf16.mxu0 %v5681_v32  ;;  %v5760_v29 = vld [vmem:[%s8343_s1 + $0x490] ss:$48 sps:$4 sm:$0xff]   ;;  %v5771_v32 = vld [vmem:[%s8343_s1 + $0x13c] ss:$48 sps:$4 sm:$0xff]  }
  0x55   :  { %1935 = vmatprep.subr.bf16.mxu1 %v5678_v31  ;;  %v5768_v31 = vld [vmem:[%s8343_s1 + $0x434] ss:$48 sps:$4 sm:$0xff]  }
  0x57   :  { %1963 = vmatpush1.bf16.msra.mxu0 %v5679_v34  ;;  %v5769_v34 = vld [vmem:[%s8343_s1 + $0x138] ss:$48 sps:$4 sm:$0xff]  }
  0x58   :  { %1936 = vmatpush2.bf16.msra.mxu1 %v5676_v33  ;;  %1964 = vmatprep.subr.bf16.mxu0 %v5687_v36  ;;  %v5766_v33 = vld [vmem:[%s8343_s1 + $0x430] ss:$48 sps:$4 sm:$0xff]   ;;  %v5777_v36 = vld [vmem:[%s8343_s1 + $0xdc] ss:$48 sps:$4 sm:$0xff]  }
  0x59   :  { %1937 = vmatprep.subr.bf16.mxu1 %v5684_v35  ;;  %v5774_v35 = vld [vmem:[%s8343_s1 + $0x3d4] ss:$48 sps:$4 sm:$0xff]  }
  0x5b   :  { %1965 = vmatpush1.bf16.msra.mxu0 %v5685_v39  ;;  %v5775_v39 = vld [vmem:[%s8343_s1 + $0xd8] ss:$48 sps:$4 sm:$0xff]  }
  0x5c   :  { %1938 = vmatpush2.bf16.msra.mxu1 %v5682_v38  ;;  %1966 = vmatprep.subr.bf16.mxu0 %v5693_v41  ;;  %v5772_v38 = vld [vmem:[%s8343_s1 + $0x3d0] ss:$48 sps:$4 sm:$0xff]   ;;  %v5783_v41 = vld [vmem:[%s8343_s1 + $0x7c] ss:$48 sps:$4 sm:$0xff]  }
  0x5d   :  { %1939 = vmatprep.subr.bf16.mxu1 %v5690_v40  ;;  %v5780_v40 = vld [vmem:[%s8343_s1 + $0x374] ss:$48 sps:$4 sm:$0xff]  }
  0x5f   :  { %1967 = vmatpush1.bf16.msra.mxu0 %v5691_v43  ;;  %v5781_v43 = vld [vmem:[%s8343_s1 + $0x78] ss:$48 sps:$4 sm:$0xff]  }
  0x60   :  { %1940 = vmatpush2.bf16.msra.mxu1 %v5688_v42  ;;  %1995 = vmatprep.subr.bf16.mxu0 %v5696_v44  ;;  %v5778_v42 = vld [vmem:[%s8343_s1 + $0x370] ss:$48 sps:$4 sm:$0xff]   ;;  %v5786_v44 = vld [vmem:[%s8343_s1 + $0x314] ss:$48 sps:$4 sm:$0xff]  }
  0x61   :  { %2038 = vmatprep.subr.bf16.mxu1 %v5699_v45  ;;  %v5789_v45 = vld [vmem:[%s8343_s1 + $0x1c] ss:$48 sps:$4 sm:$0xff]  }
  0x62   :  { %1985 = vmatmul.mubr.bf16.vlgmr.msra.gmra.mxu0 %v6532_v37 }
  0x63   :  { %1942 = vmatmul.mubr.bf16.vlgmr.msra.gmra.mxu1 %v6647_v12  ;;  %1996 = vmatpush1.bf16.msra.mxu0 %v5694_v46  ;;  %v5784_v46 = vld [vmem:[%s8343_s1 + $0x310] ss:$48 sps:$4 sm:$0xff]  }
  0x64   :  { %2039 = vmatpush1.bf16.msra.mxu1 %v5697_v47  ;;  %1997 = vmatprep.subr.bf16.mxu0 %v5702_v48  ;;  %v5787_v47 = vld [vmem:[%s8343_s1 + $0x18] ss:$48 sps:$4 sm:$0xff]   ;;  %v5792_v48 = vld [vmem:[%s8343_s1 + $0x5bc] ss:$48 sps:$4 sm:$0xff]  }
  0x65   :  { %2040 = vmatprep.subr.bf16.mxu1 %v5705_v49  ;;  %2070 = vmatprep.mubr.bf16.mxu1 %v6389_v2  ;;  %v5795_v49 = vld [vmem:[%s8343_s1 + $0x8bc] ss:$48 sps:$4 sm:$0xff]  }
  0x66   :  { %2027 = vmatprep.mubr.bf16.mxu0 %v6583_v54 }
  0x67   :  { %1998 = vmatpush1.bf16.msra.mxu0 %v5700_v50  ;;  %v5790_v50 = vld [vmem:[%s8343_s1 + $0x5b8] ss:$48 sps:$4 sm:$0xff]  }
  0x68   :  { %2041 = vmatpush1.bf16.msra.mxu1 %v5703_v51  ;;  %1999 = vmatprep.subr.bf16.mxu0 %v5708_v52  ;;  %v5793_v51 = vld [vmem:[%s8343_s1 + $0x8b8] ss:$48 sps:$4 sm:$0xff]   ;;  %v5798_v52 = vld [vmem:[%s8343_s1 + $0x55c] ss:$48 sps:$4 sm:$0xff]  }
  0x69   :  { %2042 = vmatprep.subr.bf16.mxu1 %v5711_v53  ;;  %v5801_v53 = vld [vmem:[%s8343_s1 + $0x85c] ss:$48 sps:$4 sm:$0xff]  }
  0x6b   :  { %2000 = vmatpush1.bf16.msra.mxu0 %v5706_v55  ;;  %v5796_v55 = vld [vmem:[%s8343_s1 + $0x558] ss:$48 sps:$4 sm:$0xff]  }
  0x6c   :  { %2043 = vmatpush1.bf16.msra.mxu1 %v5709_v56  ;;  %2001 = vmatprep.subr.bf16.mxu0 %v5714_v57  ;;  %v5799_v56 = vld [vmem:[%s8343_s1 + $0x858] ss:$48 sps:$4 sm:$0xff]   ;;  %v5804_v57 = vld [vmem:[%s8343_s1 + $0x4fc] ss:$48 sps:$4 sm:$0xff]  }
  0x6d   :  { %2044 = vmatprep.subr.bf16.mxu1 %v5717_v58  ;;  %v5807_v58 = vld [vmem:[%s8343_s1 + $0x7fc] ss:$48 sps:$4 sm:$0xff]  }
  0x6f   :  { %2002 = vmatpush1.bf16.msra.mxu0 %v5712_v59  ;;  %v5802_v59 = vld [vmem:[%s8343_s1 + $0x4f8] ss:$48 sps:$4 sm:$0xff]  }
  0x70   :  { %2045 = vmatpush1.bf16.msra.mxu1 %v5715_v60  ;;  %2003 = vmatprep.subr.bf16.mxu0 %v5720_v61  ;;  %v5805_v60 = vld [vmem:[%s8343_s1 + $0x7f8] ss:$48 sps:$4 sm:$0xff]   ;;  %v5810_v61 = vld [vmem:[%s8343_s1 + $0x49c] ss:$48 sps:$4 sm:$0xff]  }
  0x71   :  { %2046 = vmatprep.subr.bf16.mxu1 %v5723_v62  ;;  %v5813_v62 = vld [vmem:[%s8343_s1 + $0x79c] ss:$48 sps:$4 sm:$0xff]  }
  0x73   :  { %2004 = vmatpush1.bf16.msra.mxu0 %v5718_v63  ;;  %v5808_v63 = vld [vmem:[%s8343_s1 + $0x498] ss:$48 sps:$4 sm:$0xff]  }
  0x74   :  { %2047 = vmatpush1.bf16.msra.mxu1 %v5721_v0  ;;  %2005 = vmatprep.subr.bf16.mxu0 %v5726_v1  ;;  %v5811_v0 = vld [vmem:[%s8343_s1 + $0x798] ss:$48 sps:$4 sm:$0xff]   ;;  %v5816_v1 = vld [vmem:[%s8343_s1 + $0x43c] ss:$48 sps:$4 sm:$0xff]  }
  0x75   :  { %2048 = vmatprep.subr.bf16.mxu1 %v5729_v3  ;;  %v5819_v3 = vld [vmem:[%s8343_s1 + $0x73c] ss:$48 sps:$4 sm:$0xff]  }
  0x77   :  { %2006 = vmatpush1.bf16.msra.mxu0 %v5724_v4  ;;  %v5814_v4 = vld [vmem:[%s8343_s1 + $0x438] ss:$48 sps:$4 sm:$0xff]  }
  0x78   :  { %2049 = vmatpush1.bf16.msra.mxu1 %v5727_v5  ;;  %2007 = vmatprep.subr.bf16.mxu0 %v5732_v6  ;;  %v5817_v5 = vld [vmem:[%s8343_s1 + $0x738] ss:$48 sps:$4 sm:$0xff]   ;;  %v5822_v6 = vld [vmem:[%s8343_s1 + $0x3dc] ss:$48 sps:$4 sm:$0xff]  }
  0x79   :  { %2050 = vmatprep.subr.bf16.mxu1 %v5735_v7  ;;  %v5825_v7 = vld [vmem:[%s8343_s1 + $0x6dc] ss:$48 sps:$4 sm:$0xff]  }
  0x7b   :  { %2008 = vmatpush1.bf16.msra.mxu0 %v5730_v8  ;;  %v5820_v8 = vld [vmem:[%s8343_s1 + $0x3d8] ss:$48 sps:$4 sm:$0xff]  }
  0x7c   :  { %2051 = vmatpush1.bf16.msra.mxu1 %v5733_v9  ;;  %2009 = vmatprep.subr.bf16.mxu0 %v5738_v10  ;;  %v5823_v9 = vld [vmem:[%s8343_s1 + $0x6d8] ss:$48 sps:$4 sm:$0xff]   ;;  %v5828_v10 = vld [vmem:[%s8343_s1 + $0x37c] ss:$48 sps:$4 sm:$0xff]  }
  0x7d   :  { %2052 = vmatprep.subr.bf16.mxu1 %v5741_v11  ;;  %v5831_v11 = vld [vmem:[%s8343_s1 + $0x67c] ss:$48 sps:$4 sm:$0xff]  }
  0x7f   :  { %2010 = vmatpush1.bf16.msra.mxu0 %v5736_v13  ;;  %v5826_v13 = vld [vmem:[%s8343_s1 + $0x378] ss:$48 sps:$4 sm:$0xff]  }
  0x80   :  { %2053 = vmatpush1.bf16.msra.mxu1 %v5739_v14  ;;  %2011 = vmatprep.subr.bf16.mxu0 %v5744_v15  ;;  %v5829_v14 = vld [vmem:[%s8343_s1 + $0x678] ss:$48 sps:$4 sm:$0xff]   ;;  %v5834_v15 = vld [vmem:[%s8343_s1 + $0x31c] ss:$48 sps:$4 sm:$0xff]  }
  0x81   :  { %2081 = vmatprep.subr.bf16.mxu1 %v5747_v16  ;;  %v5837_v16 = vld [vmem:[%s8343_s1 + $0x61c] ss:$48 sps:$4 sm:$0xff]  }
  0x83   :  { %2071 = vmatmul.mubr.bf16.vlgmr.msra.gmra.mxu1 %v6532_v37  ;;  %2012 = vmatpush2.bf16.msra.mxu0 %v5742_v17  ;;  %v5832_v17 = vld [vmem:[%s8343_s1 + $0x318] ss:$48 sps:$4 sm:$0xff]  }
  0x84   :  { %2082 = vmatpush1.bf16.msra.mxu1 %v5745_v18  ;;  %2013 = vmatprep.subr.bf16.mxu0 %v5750_v19  ;;  %v5835_v18 = vld [vmem:[%s8343_s1 + $0x618] ss:$48 sps:$4 sm:$0xff]   ;;  %v5840_v19 = vld [vmem:[%s8343_s1 + $0x2c4] ss:$48 sps:$4 sm:$0xff]  }
  0x85   :  { %2083 = vmatprep.subr.bf16.mxu1 %v5753_v20  ;;  %2113 = vmatprep.mubr.bf16.mxu1 %v6583_v54  ;;  %v5843_v20 = vld [vmem:[%s8343_s1 + $0x8c4] ss:$48 sps:$4 sm:$0xff]  }
  0x87   :  { %2014 = vmatpush2.bf16.msra.mxu0 %v5748_v21  ;;  %v5838_v21 = vld [vmem:[%s8343_s1 + $0x2c0] ss:$48 sps:$4 sm:$0xff]  }
  0x88   :  { %2084 = vmatpush1.bf16.msra.mxu1 %v5751_v22  ;;  %2015 = vmatprep.subr.bf16.mxu0 %v5756_v23  ;;  %v5841_v22 = vld [vmem:[%s8343_s1 + $0x8c0] ss:$48 sps:$4 sm:$0xff]   ;;  %v5846_v23 = vld [vmem:[%s8343_s1 + $0x264] ss:$48 sps:$4 sm:$0xff]  }
  0x89   :  { %2085 = vmatprep.subr.bf16.mxu1 %v5759_v24  ;;  %v5849_v24 = vld [vmem:[%s8343_s1 + $0x864] ss:$48 sps:$4 sm:$0xff]  }
  0x8b   :  { %2016 = vmatpush2.bf16.msra.mxu0 %v5754_v25  ;;  %v5844_v25 = vld [vmem:[%s8343_s1 + $0x260] ss:$48 sps:$4 sm:$0xff]  }
  0x8c   :  { %2086 = vmatpush1.bf16.msra.mxu1 %v5757_v26  ;;  %2017 = vmatprep.subr.bf16.mxu0 %v5762_v27  ;;  %v5847_v26 = vld [vmem:[%s8343_s1 + $0x860] ss:$48 sps:$4 sm:$0xff]   ;;  %v5852_v27 = vld [vmem:[%s8343_s1 + $0x204] ss:$48 sps:$4 sm:$0xff]  }
  0x8d   :  { %2087 = vmatprep.subr.bf16.mxu1 %v5765_v28  ;;  %v5855_v28 = vld [vmem:[%s8343_s1 + $0x804] ss:$48 sps:$4 sm:$0xff]  }
  0x8f   :  { %2018 = vmatpush2.bf16.msra.mxu0 %v5760_v29  ;;  %v5850_v29 = vld [vmem:[%s8343_s1 + $0x200] ss:$48 sps:$4 sm:$0xff]  }
  0x90   :  { %2088 = vmatpush1.bf16.msra.mxu1 %v5763_v30  ;;  %2019 = vmatprep.subr.bf16.mxu0 %v5768_v31  ;;  %v5853_v30 = vld [vmem:[%s8343_s1 + $0x800] ss:$48 sps:$4 sm:$0xff]   ;;  %v5858_v31 = vld [vmem:[%s8343_s1 + $0x1a4] ss:$48 sps:$4 sm:$0xff]  }
  0x91   :  { %2089 = vmatprep.subr.bf16.mxu1 %v5771_v32  ;;  %v5861_v32 = vld [vmem:[%s8343_s1 + $0x7a4] ss:$48 sps:$4 sm:$0xff]  }
  0x93   :  { %2020 = vmatpush2.bf16.msra.mxu0 %v5766_v33  ;;  %v5856_v33 = vld [vmem:[%s8343_s1 + $0x1a0] ss:$48 sps:$4 sm:$0xff]  }
  0x94   :  { %2090 = vmatpush1.bf16.msra.mxu1 %v5769_v34  ;;  %2021 = vmatprep.subr.bf16.mxu0 %v5774_v35  ;;  %v5859_v34 = vld [vmem:[%s8343_s1 + $0x7a0] ss:$48 sps:$4 sm:$0xff]   ;;  %v5864_v35 = vld [vmem:[%s8343_s1 + $0x144] ss:$48 sps:$4 sm:$0xff]  }
  0x95   :  { %2091 = vmatprep.subr.bf16.mxu1 %v5777_v36  ;;  %v5867_v36 = vld [vmem:[%s8343_s1 + $0x744] ss:$48 sps:$4 sm:$0xff]  }
  0x97   :  { %2022 = vmatpush2.bf16.msra.mxu0 %v5772_v38  ;;  %v5862_v38 = vld [vmem:[%s8343_s1 + $0x140] ss:$48 sps:$4 sm:$0xff]  }
  0x98   :  { %2092 = vmatpush1.bf16.msra.mxu1 %v5775_v39  ;;  %2023 = vmatprep.subr.bf16.mxu0 %v5780_v40  ;;  %v5865_v39 = vld [vmem:[%s8343_s1 + $0x740] ss:$48 sps:$4 sm:$0xff]   ;;  %v5870_v40 = vld [vmem:[%s8343_s1 + $0xe4] ss:$48 sps:$4 sm:$0xff]  }
  0x99   :  { %2093 = vmatprep.subr.bf16.mxu1 %v5783_v41  ;;  %v5873_v41 = vld [vmem:[%s8343_s1 + $0x6e4] ss:$48 sps:$4 sm:$0xff]  }
  0x9b   :  { %2024 = vmatpush2.bf16.msra.mxu0 %v5778_v42  ;;  %v5868_v42 = vld [vmem:[%s8343_s1 + $0xe0] ss:$48 sps:$4 sm:$0xff]  }
  0x9c   :  { %2094 = vmatpush1.bf16.msra.mxu1 %v5781_v43  ;;  %2025 = vmatprep.subr.bf16.mxu0 %v5786_v44  ;;  %v5871_v43 = vld [vmem:[%s8343_s1 + $0x6e0] ss:$48 sps:$4 sm:$0xff]   ;;  %v5876_v44 = vld [vmem:[%s8343_s1 + $0x84] ss:$48 sps:$4 sm:$0xff]  }
  0x9d   :  { %2095 = vmatprep.subr.bf16.mxu1 %v5789_v45  ;;  %v5879_v45 = vld [vmem:[%s8343_s1 + $0x684] ss:$48 sps:$4 sm:$0xff]  }
  0x9f   :  { %2026 = vmatpush2.bf16.msra.mxu0 %v5784_v46  ;;  %v5874_v46 = vld [vmem:[%s8343_s1 + $0x80] ss:$48 sps:$4 sm:$0xff]  }
  0xa0   :  { %2096 = vmatpush1.bf16.msra.mxu1 %v5787_v47  ;;  %2124 = vmatprep.subr.bf16.mxu0 %v5795_v49  ;;  %v5877_v47 = vld [vmem:[%s8343_s1 + $0x680] ss:$48 sps:$4 sm:$0xff]   ;;  %v5885_v49 = vld [vmem:[%s8343_s1 + $0x624] ss:$48 sps:$4 sm:$0xff]  }
  0xa1   :  { %2097 = vmatprep.subr.bf16.mxu1 %v5792_v48  ;;  %v5882_v48 = vld [vmem:[%s8343_s1 + $0x24] ss:$48 sps:$4 sm:$0xff]  }
  0xa2   :  { %2028 = vmatmul.mubr.bf16.vlgmr.msra.gmra.mxu0 %v6647_v12 }
  0xa3   :  { %2125 = vmatpush1.bf16.msra.mxu0 %v5793_v51  ;;  %2156 = vmatprep.mubr.bf16.mxu0 %v6389_v2  ;;  %v5883_v51 = vld [vmem:[%s8343_s1 + $0x620] ss:$48 sps:$4 sm:$0xff]  }
  0xa4   :  { %2098 = vmatpush2.bf16.msra.mxu1 %v5790_v50  ;;  %2126 = vmatprep.subr.bf16.mxu0 %v5801_v53  ;;  %v5880_v50 = vld [vmem:[%s8343_s1 + $0x20] ss:$48 sps:$4 sm:$0xff]   ;;  %v5891_v53 = vld [vmem:[%s8343_s1 + $0x2cc] ss:$48 sps:$4 sm:$0xff]  }
  0xa5   :  { %2099 = vmatprep.subr.bf16.mxu1 %v5798_v52  ;;  %v5888_v52 = vld [vmem:[%s8343_s1 + $0x5c4] ss:$48 sps:$4 sm:$0xff]  }
  0xa7   :  { %2127 = vmatpush1.bf16.msra.mxu0 %v5799_v56  ;;  %v5889_v56 = vld [vmem:[%s8343_s1 + $0x2c8] ss:$48 sps:$4 sm:$0xff]  }
  0xa8   :  { %2100 = vmatpush2.bf16.msra.mxu1 %v5796_v55  ;;  %2128 = vmatprep.subr.bf16.mxu0 %v5807_v58  ;;  %v5886_v55 = vld [vmem:[%s8343_s1 + $0x5c0] ss:$48 sps:$4 sm:$0xff]   ;;  %v5897_v58 = vld [vmem:[%s8343_s1 + $0x26c] ss:$48 sps:$4 sm:$0xff]  }
  0xa9   :  { %2101 = vmatprep.subr.bf16.mxu1 %v5804_v57  ;;  %v5894_v57 = vld [vmem:[%s8343_s1 + $0x564] ss:$48 sps:$4 sm:$0xff]  }
  0xab   :  { %2129 = vmatpush1.bf16.msra.mxu0 %v5805_v60  ;;  %v5895_v60 = vld [vmem:[%s8343_s1 + $0x268] ss:$48 sps:$4 sm:$0xff]  }
  0xac   :  { %2102 = vmatpush2.bf16.msra.mxu1 %v5802_v59  ;;  %2130 = vmatprep.subr.bf16.mxu0 %v5813_v62  ;;  %v5892_v59 = vld [vmem:[%s8343_s1 + $0x560] ss:$48 sps:$4 sm:$0xff]   ;;  %v5903_v62 = vld [vmem:[%s8343_s1 + $0x20c] ss:$48 sps:$4 sm:$0xff]  }
  0xad   :  { %2103 = vmatprep.subr.bf16.mxu1 %v5810_v61  ;;  %v5900_v61 = vld [vmem:[%s8343_s1 + $0x504] ss:$48 sps:$4 sm:$0xff]  }
  0xaf   :  { %2131 = vmatpush1.bf16.msra.mxu0 %v5811_v0  ;;  %v5901_v0 = vld [vmem:[%s8343_s1 + $0x208] ss:$48 sps:$4 sm:$0xff]  }
  0xb0   :  { %2104 = vmatpush2.bf16.msra.mxu1 %v5808_v63  ;;  %2132 = vmatprep.subr.bf16.mxu0 %v5819_v3  ;;  %v5898_v63 = vld [vmem:[%s8343_s1 + $0x500] ss:$48 sps:$4 sm:$0xff]  }
  0xb1   :  { %2105 = vmatprep.subr.bf16.mxu1 %v5816_v1  ;;  %v5906_v1 = vld [vmem:[%s8343_s1 + $0x4a4] ss:$48 sps:$4 sm:$0xff]   ;;  %v5904_v3 = vld [vmem:[%s8343_s1 + $0x4a0] ss:$48 sps:$4 sm:$0xff]  }
  0xb3   :  { %2133 = vmatpush1.bf16.msra.mxu0 %v5817_v5  ;;  %v5912_v5 = vld [vmem:[%s8343_s1 + $0x444] ss:$48 sps:$4 sm:$0xff]  }
  0xb4   :  { %2106 = vmatpush2.bf16.msra.mxu1 %v5814_v4  ;;  %2134 = vmatprep.subr.bf16.mxu0 %v5825_v7  ;;  %v5907_v4 = vld [vmem:[%s8343_s1 + $0x1a8] ss:$48 sps:$4 sm:$0xff]   ;;  %v5910_v7 = vld [vmem:[%s8343_s1 + $0x440] ss:$48 sps:$4 sm:$0xff]  }
  0xb5   :  { %2107 = vmatprep.subr.bf16.mxu1 %v5822_v6  ;;  %v5915_v6 = vld [vmem:[%s8343_s1 + $0x14c] ss:$48 sps:$4 sm:$0xff]  }
  0xb7   :  { %2135 = vmatpush1.bf16.msra.mxu0 %v5823_v9  ;;  %v5918_v9 = vld [vmem:[%s8343_s1 + $0x3e4] ss:$48 sps:$4 sm:$0xff]  }
  0xb8   :  { %2108 = vmatpush2.bf16.msra.mxu1 %v5820_v8  ;;  %2136 = vmatprep.subr.bf16.mxu0 %v5831_v11  ;;  %v5913_v8 = vld [vmem:[%s8343_s1 + $0x148] ss:$48 sps:$4 sm:$0xff]   ;;  %v5916_v11 = vld [vmem:[%s8343_s1 + $0x3e0] ss:$48 sps:$4 sm:$0xff]  }
  0xb9   :  { %2109 = vmatprep.subr.bf16.mxu1 %v5828_v10  ;;  %v5921_v10 = vld [vmem:[%s8343_s1 + $0xec] ss:$48 sps:$4 sm:$0xff]  }
  0xbb   :  { %2137 = vmatpush1.bf16.msra.mxu0 %v5829_v14  ;;  %v5924_v14 = vld [vmem:[%s8343_s1 + $0x384] ss:$48 sps:$4 sm:$0xff]  }
  0xbc   :  { %2110 = vmatpush2.bf16.msra.mxu1 %v5826_v13  ;;  %2138 = vmatprep.subr.bf16.mxu0 %v5837_v16  ;;  %v5919_v13 = vld [vmem:[%s8343_s1 + $0xe8] ss:$48 sps:$4 sm:$0xff]   ;;  %v5927_v16 = vld [vmem:[%s8343_s1 + $0x8c] ss:$48 sps:$4 sm:$0xff]  }
  0xbd   :  { %2111 = vmatprep.subr.bf16.mxu1 %v5834_v15  ;;  %v323_v15 = vlaneseq }
  0xbf   :  { %2139 = vmatpush1.bf16.msra.mxu0 %v5835_v18  ;;  %v5925_v18 = vld [vmem:[%s8343_s1 + $0x88] ss:$48 sps:$4 sm:$0xff]  }
  0xc0   :  { %2112 = vmatpush2.bf16.msra.mxu1 %v5832_v17  ;;  %2167 = vmatprep.subr.bf16.mxu0 %v5840_v19  ;;  %v5922_v17 = vld [vmem:[%s8343_s1 + $0x380] ss:$48 sps:$4 sm:$0xff]   ;;  %v5930_v19 = vld [vmem:[%s8343_s1 + $0x324] ss:$48 sps:$4 sm:$0xff]  }
  0xc1   :  { %2210 = vmatprep.subr.bf16.mxu1 %v5843_v20  ;;  %v7226_v20 = vshrl.u32 %v323_v15, 7  ;;  %v5976_v15 = vld [vmem:[%s8343_s1 + $0x328] ss:$48 sps:$4 sm:$0xff]  }
  0xc2   :  { %2157 = vmatmul.mubr.bf16.vlgmr.msra.gmra.mxu0 %v6532_v37 }
  0xc3   :  { %2114 = vmatmul.mubr.bf16.vlgmr.msra.gmra.mxu1 %v6647_v12  ;;  %2168 = vmatpush1.bf16.msra.mxu0 %v5838_v21  ;;  %v5933_v21 = vld [vmem:[%s8343_s1 + $0x2c] ss:$48 sps:$4 sm:$0xff]  }
  0xc4   :  { %2211 = vmatpush1.bf16.msra.mxu1 %v5841_v22  ;;  %2169 = vmatprep.subr.bf16.mxu0 %v5846_v23  ;;  %v5928_v22 = vld [vmem:[%s8343_s1 + $0x320] ss:$48 sps:$4 sm:$0xff]   ;;  %v5931_v23 = vld [vmem:[%s8343_s1 + $0x28] ss:$48 sps:$4 sm:$0xff]  }
  0xc5   :  { %2212 = vmatprep.subr.bf16.mxu1 %v5849_v24  ;;  %2242 = vmatprep.mubr.bf16.mxu1 %v6389_v2  ;;  %v7240_v24 = vld [vmem:[%s8344_s2] sm:$0xff] }
  0xc6   :  { %2199 = vmatprep.mubr.bf16.mxu0 %v6583_v54 }
  0xc7   :  { %2170 = vmatpush1.bf16.msra.mxu0 %v5844_v25  ;;  %v7243_v25 = vsub.s32 0, %v7226_v20 }
  0xc8   :  { %2213 = vmatpush1.bf16.msra.mxu1 %v5847_v26  ;;  %2171 = vmatprep.subr.bf16.mxu0 %v5852_v27  ;;  %v5936_v26 = vld [vmem:[%s8343_s1 + $0x5cc] ss:$48 sps:$4 sm:$0xff]  }
  0xc9   :  { %2214 = vmatprep.subr.bf16.mxu1 %v5855_v28  ;;  %v5939_v27 = vld [vmem:[%s8343_s1 + $0x8cc] ss:$48 sps:$4 sm:$0xff]   ;;  %v5934_v28 = vld [vmem:[%s8343_s1 + $0x5c8] ss:$48 sps:$4 sm:$0xff]  }
  0xcb   :  { %2172 = vmatpush1.bf16.msra.mxu0 %v5850_v29  ;;  %v326_v29 = vrot.slane %v7240_v24, %v7243_v25 }
  0xcc   :  { %2215 = vmatpush1.bf16.msra.mxu1 %v5853_v30  ;;  %2173 = vmatprep.subr.bf16.mxu0 %v5858_v31  ;;  %v5937_v30 = vld [vmem:[%s8343_s1 + $0x8c8] ss:$48 sps:$4 sm:$0xff]   ;;  %v5942_v31 = vld [vmem:[%s8343_s1 + $0x56c] ss:$48 sps:$4 sm:$0xff]  }
  0xcd   :  { %2216 = vmatprep.subr.bf16.mxu1 %v5861_v32 }
  0xcf   :  { %2174 = vmatpush1.bf16.msra.mxu0 %v5856_v33  ;;  %v5945_v33 = vld [vmem:[%s8343_s1 + $0x86c] ss:$48 sps:$4 sm:$0xff]  }
  0xd0   :  { %2217 = vmatpush1.bf16.msra.mxu1 %v5859_v34  ;;  %2175 = vmatprep.subr.bf16.mxu0 %v5864_v35  ;;  %v5940_v35 = vld [vmem:[%s8343_s1 + $0x568] ss:$48 sps:$4 sm:$0xff]  }
  0xd1   :  { %2218 = vmatprep.subr.bf16.mxu1 %v5867_v36  ;;  %v5943_v36 = vld [vmem:[%s8343_s1 + $0x868] ss:$48 sps:$4 sm:$0xff]  }
  0xd3   :  { %2176 = vmatpush1.bf16.msra.mxu0 %v5862_v38 }
  0xd4   :  { %2219 = vmatpush1.bf16.msra.mxu1 %v5865_v39  ;;  %2177 = vmatprep.subr.bf16.mxu0 %v5870_v40  ;;  %v5948_v39 = vld [vmem:[%s8343_s1 + $0x50c] ss:$48 sps:$4 sm:$0xff]  }
  0xd5   :  { %2220 = vmatprep.subr.bf16.mxu1 %v5873_v41  ;;  %v5951_v40 = vld [vmem:[%s8343_s1 + $0x80c] ss:$48 sps:$4 sm:$0xff]  }
  0xd7   :  { %2178 = vmatpush1.bf16.msra.mxu0 %v5868_v42 }
  0xd8   :  { %2221 = vmatpush1.bf16.msra.mxu1 %v5871_v43  ;;  %2179 = vmatprep.subr.bf16.mxu0 %v5876_v44  ;;  %v5946_v44 = vld [vmem:[%s8343_s1 + $0x508] ss:$48 sps:$4 sm:$0xff]  }
  0xd9   :  { %2222 = vmatprep.subr.bf16.mxu1 %v5879_v45  ;;  %v5949_v45 = vld [vmem:[%s8343_s1 + $0x808] ss:$48 sps:$4 sm:$0xff]  }
  0xdb   :  { %2180 = vmatpush1.bf16.msra.mxu0 %v5874_v46 }
  0xdc   :  { %2223 = vmatpush1.bf16.msra.mxu1 %v5877_v47  ;;  %2181 = vmatprep.subr.bf16.mxu0 %v5882_v48  ;;  %v5954_v47 = vld [vmem:[%s8343_s1 + $0x4ac] ss:$48 sps:$4 sm:$0xff]  }
  0xdd   :  { %2224 = vmatprep.subr.bf16.mxu1 %v5885_v49  ;;  %v5957_v48 = vld [vmem:[%s8343_s1 + $0x7ac] ss:$48 sps:$4 sm:$0xff]  }
  0xdf   :  { %2182 = vmatpush1.bf16.msra.mxu0 %v5880_v50 }
  0xe0   :  { %2225 = vmatpush1.bf16.msra.mxu1 %v5883_v51  ;;  %2183 = vmatprep.subr.bf16.mxu0 %v5888_v52  ;;  %v5955_v52 = vld [vmem:[%s8343_s1 + $0x7a8] ss:$48 sps:$4 sm:$0xff]  }
  0xe1   :  { %2253 = vmatprep.subr.bf16.mxu1 %v5891_v53  ;;  %v5960_v53 = vld [vmem:[%s8343_s1 + $0x44c] ss:$48 sps:$4 sm:$0xff]  }
  0xe3   :  { %2243 = vmatmul.mubr.bf16.vlgmr.msra.gmra.mxu1 %v6532_v37  ;;  %2184 = vmatpush2.bf16.msra.mxu0 %v5886_v55  ;;  %v1900_v32 = vpop.f32.mrf.mxu1  ;;  %v5963_v55 = vld [vmem:[%s8343_s1 + $0x74c] ss:$48 sps:$4 sm:$0xff]  }
  0xe4   :  { %2254 = vmatpush1.bf16.msra.mxu1 %v5889_v56  ;;  %2185 = vmatprep.subr.bf16.mxu0 %v5894_v57 }
  0xe5   :  { %2255 = vmatprep.subr.bf16.mxu1 %v5897_v58  ;;  %2285 = vmatprep.mubr.bf16.mxu1 %v6583_v54  ;;  %v5909_v54 = vld [vmem:[%s8343_s1 + $0x1ac] ss:$48 sps:$4 sm:$0xff]   ;;  %v1902_v41 = vpop.f32.mrf.mxu1 }
  0xe7   :  { %2186 = vmatpush2.bf16.msra.mxu0 %v5892_v59  ;;  %v1904_v50 = vpop.f32.mrf.mxu1  ;;  %v5958_v59 = vld [vmem:[%s8343_s1 + $0x448] ss:$48 sps:$4 sm:$0xff]  }
  0xe8   :  { %2256 = vmatpush1.bf16.msra.mxu1 %v5895_v60  ;;  %2187 = vmatprep.subr.bf16.mxu0 %v5900_v61  ;;  %v5961_v60 = vld [vmem:[%s8343_s1 + $0x748] ss:$48 sps:$4 sm:$0xff]   ;;  %v5966_v61 = vld [vmem:[%s8343_s1 + $0x3ec] ss:$48 sps:$4 sm:$0xff]  }
  0xe9   :  { %2257 = vmatprep.subr.bf16.mxu1 %v5903_v62  ;;  %v5969_v62 = vld [vmem:[%s8343_s1 + $0x6ec] ss:$48 sps:$4 sm:$0xff]  }
  0xeb   :  { %2188 = vmatpush2.bf16.msra.mxu0 %v5898_v63  ;;  %v7318_v63 = vsub.s32 1, %v7226_v20 }
  0xec   :  { %2258 = vmatpush1.bf16.msra.mxu1 %v5901_v0  ;;  %2189 = vmatprep.subr.bf16.mxu0 %v5906_v1  ;;  %v5964_v0 = vld [vmem:[%s8343_s1 + $0x3e8] ss:$48 sps:$4 sm:$0xff]  }
  0xed   :  { %2259 = vmatprep.subr.bf16.mxu1 %v5909_v54  ;;  %v5967_v54 = vld [vmem:[%s8343_s1 + $0x6e8] ss:$48 sps:$4 sm:$0xff]  }
  0xef   :  { %2190 = vmatpush2.bf16.msra.mxu0 %v5904_v3  ;;  %v330_v3 = vrot.slane %v7240_v24, %v7318_v63 }
  0xf0   :  { %2260 = vmatpush1.bf16.msra.mxu1 %v5907_v4  ;;  %2191 = vmatprep.subr.bf16.mxu0 %v5912_v5  ;;  %v5972_v4 = vld [vmem:[%s8343_s1 + $0x38c] ss:$48 sps:$4 sm:$0xff]  }
  0xf1   :  { %2261 = vmatprep.subr.bf16.mxu1 %v5915_v6  ;;  %v5975_v5 = vld [vmem:[%s8343_s1 + $0x68c] ss:$48 sps:$4 sm:$0xff]  }
  0xf3   :  { %2192 = vmatpush2.bf16.msra.mxu0 %v5910_v7  ;;  %v5970_v7 = vld [vmem:[%s8343_s1 + $0x388] ss:$48 sps:$4 sm:$0xff]  }
  0xf4   :  { %2262 = vmatpush1.bf16.msra.mxu1 %v5913_v8  ;;  %2193 = vmatprep.subr.bf16.mxu0 %v5918_v9  ;;  %v5973_v8 = vld [vmem:[%s8343_s1 + $0x688] ss:$48 sps:$4 sm:$0xff]  }
  0xf5   :  { %2263 = vmatprep.subr.bf16.mxu1 %v5921_v10  ;;  %v1906_v10 = vpop.f32.mrf.mxu1 }
  0xf7   :  { %2194 = vmatpush2.bf16.msra.mxu0 %v5916_v11  ;;  %v5978_v11 = vld [vmem:[%s8343_s1 + $0x32c] ss:$48 sps:$4 sm:$0xff]  }
  0xf8   :  { %2264 = vmatpush1.bf16.msra.mxu1 %v5919_v13  ;;  %2195 = vmatprep.subr.bf16.mxu0 %v5924_v14  ;;  %v5981_v13 = vld [vmem:[%s8343_s1 + $0x62c] ss:$48 sps:$4 sm:$0xff]  }
  0xf9   :  { %2265 = vmatprep.subr.bf16.mxu1 %v5927_v16  ;;  %v5979_v16 = vld [vmem:[%s8343_s1 + $0x628] ss:$48 sps:$4 sm:$0xff]  }
  0xfb   :  { %2196 = vmatpush2.bf16.msra.mxu0 %v5922_v17 }
  0xfc   :  { %2266 = vmatpush1.bf16.msra.mxu1 %v5925_v18  ;;  %2197 = vmatprep.subr.bf16.mxu0 %v5930_v19  ;;  %v5984_v18 = vld [vmem:[%s8345_s3 + $0xac] ss:$12 sps:$4 sm:$0xff]  }
  0xfd   :  { %2267 = vmatprep.subr.bf16.mxu1 %v5933_v21  ;;  %v5987_v19 = vld [vmem:[%s8345_s3 + $0x22c] ss:$12 sps:$4 sm:$0xff]  }
  0xff   :  { %2198 = vmatpush2.bf16.msra.mxu0 %v5928_v22  ;;  %v5982_v22 = vld [vmem:[%s8345_s3 + $0xa8] ss:$12 sps:$4 sm:$0xff]  }
 0x100   :  { %2268 = vmatpush1.bf16.msra.mxu1 %v5931_v23  ;;  %2296 = vmatprep.subr.bf16.mxu0 %v5939_v27  ;;  %v337_v23 = vsub.s32 3, %v7226_v20  ;;  %v5990_v27 = vld [vmem:[%s8345_s3 + $0x94] ss:$12 sps:$4 sm:$0xff]  }
 0x101   :  { %2269 = vmatprep.subr.bf16.mxu1 %v5936_v26  ;;  %v5985_v26 = vld [vmem:[%s8345_s3 + $0x228] ss:$12 sps:$4 sm:$0xff]  }
 0x102   :  { %v1857_v34 = vpop.f32.mrf.mxu0  ;;  %2200 = vmatmul.mubr.bf16.vlgmr.msra.gmra.mxu0 %v6647_v12 }
 0x103   :  { %v1858_v38 = vadd.f32 %v1857_v34, %v326_v29  ;;  %2297 = vmatpush1.bf16.msra.mxu0 %v5937_v30  ;;  %2328 = vmatprep.mubr.bf16.mxu0 %v6389_v2  ;;  %v5952_v2 = vld [vmem:[%s8343_s1 + $0x4a8] ss:$48 sps:$4 sm:$0xff]   ;;  %v338_v30 = vrot.slane %v7240_v24, %v337_v23 }
 0x104   :  { %2270 = vmatpush2.bf16.msra.mxu1 %v5934_v28  ;;  %v1859_v42 = vpop.f32.mrf.mxu0  ;;  %2298 = vmatprep.subr.bf16.mxu0 %v5945_v33 }
 0x105   :  { %2271 = vmatprep.subr.bf16.mxu1 %v5942_v31  ;;  %v1901_v43 = vadd.f32 %v1900_v32, %v1858_v38  ;;  %v1860_v9 = vadd.f32 %v1859_v42, %v330_v3  ;;  %v5988_v31 = vld [vmem:[%s8345_s3 + $0x90] ss:$12 sps:$4 sm:$0xff]   ;;  %v5993_v32 = vld [vmem:[%s8345_s3 + $0x214] ss:$12 sps:$4 sm:$0xff]  }
 0x106   :  { %v1861_v46 = vpop.f32.mrf.mxu0 }
 0x107   :  { %v1862_v49 = vadd.f32 %v1861_v46, %v326_v29  ;;  %2299 = vmatpush1.bf16.msra.mxu0 %v5943_v36  ;;  %v2339_v56 = vmax.f32 %v1901_v43, 0.0  ;;  %v1903_v17 = vadd.f32 %v1902_v41, %v1860_v9  ;;  %v5996_v36 = vld [vmem:[%s8345_s3 + $0x7c] ss:$12 sps:$4 sm:$0xff]   ;;  %v5997_v43 = vld [vmem:[%s8345_s3 + $0x1f8] ss:$12 sps:$4 sm:$0xff]  }
 0x108   :  { %2272 = vmatpush2.bf16.msra.mxu1 %v5940_v35  ;;  %2300 = vmatprep.subr.bf16.mxu0 %v5951_v40  ;;  %v1863_v1 = vpop.f32.mrf.mxu0  ;;  %v5991_v35 = vld [vmem:[%s8345_s3 + $0x210] ss:$12 sps:$4 sm:$0xff]   ;;  %v6027_v9 = vld [vmem:[%s8345_s3 + $0x180] ss:$12 sps:$4 sm:$0xff]  }
 0x109   :  { %2273 = vmatprep.subr.bf16.mxu1 %v5948_v39  ;;  %v1905_v51 = vadd.f32 %v1904_v50, %v1862_v49  ;;  %v1864_v6 = vadd.f32 %v1863_v1, %v330_v3  ;;  %v2340_v28 = vmax.f32 %v1903_v17, 0.0  ;;  %v6002_v46 = vld [vmem:[%s8345_s3 + $0x64] ss:$12 sps:$4 sm:$0xff]   ;;  %v6000_v49 = vld [vmem:[%s8345_s3 + $0x60] ss:$12 sps:$4 sm:$0xff]  }
 0x10a   :  { %v6015_v1 = vld [vmem:[%s8345_s3 + $0x1b0] ss:$12 sps:$4 sm:$0xff]   ;;  %v6041_v17 = vld [vmem:[%s8345_s3 + $0x2d4] ss:$12 sps:$4 sm:$0xff]  }
 0x10b   :  { %v2351_v57 = vmax.f32 %v1905_v51, 0.0  ;;  %2301 = vmatpush1.bf16.msra.mxu0 %v5949_v45  ;;  %v1907_v14 = vadd.f32 %v1906_v10, %v1864_v6  ;;  %v6003_v51 = vld [vmem:[%s8345_s3 + $0x1e0] ss:$12 sps:$4 sm:$0xff]   ;;  %v6023_v3 = vld [vmem:[%s8345_s3 + $0x19c] ss:$12 sps:$4 sm:$0xff]  }
 0x10c   :  { %2274 = vmatpush2.bf16.msra.mxu1 %v5946_v44  ;;  %2302 = vmatprep.subr.bf16.mxu0 %v5957_v48  ;;  %v6026_v6 = vld [vmem:[%s8345_s3 + $0x4] ss:$12 sps:$4 sm:$0xff]   ;;  %v6032_v10 = vld [vmem:[%s8345_s3 + $0x16c] ss:$12 sps:$4 sm:$0xff]  }
 0x10d   :  { %2275 = vmatprep.subr.bf16.mxu1 %v5954_v47  ;;  %v7303_v58 = vpack.c.bf16 %v2351_v57, %v2339_v56  ;;  %v2352_v21 = vmax.f32 %v1907_v14, 0.0  ;;  %v6005_v47 = vld [vmem:[%s8345_s3 + $0x1e4] ss:$12 sps:$4 sm:$0xff]   ;;  %v6033_v14 = vld [vmem:[%s8345_s3 + $0x2e8] ss:$12 sps:$4 sm:$0xff]  }
 0x10f   :  { %2303 = vmatpush1.bf16.msra.mxu0 %v5955_v52  ;;  %v7368_v29 = vpack.c.bf16 %v2352_v21, %v2340_v28  ;;  %v6008_v52 = vld [vmem:[%s8345_s3 + $0x4c] ss:$12 sps:$4 sm:$0xff]  }
 0x110   :  { %2276 = vmatpush2.bf16.msra.mxu1 %v5952_v2  ;;  %2304 = vmatprep.subr.bf16.mxu0 %v5963_v55  ;;  %v6042_v21 = vld [vmem:[%s8345_s3 + $0x138] ss:$12 sps:$4 sm:$0xff]   ;;  %v6048_v28 = vld [vmem:[%s8345_s3 + $0x120] ss:$12 sps:$4 sm:$0xff]  }
 0x111   :  { %2277 = vmatprep.subr.bf16.mxu1 %v5960_v53  ;;  %v6011_v53 = vld [vmem:[%s8345_s3 + $0x1cc] ss:$12 sps:$4 sm:$0xff]  }
 0x113   :  { %2305 = vmatpush1.bf16.msra.mxu0 %v5961_v60  ;;  %v6009_v60 = vld [vmem:[%s8345_s3 + $0x1c8] ss:$12 sps:$4 sm:$0xff]  }
 0x114   :  { %2278 = vmatpush2.bf16.msra.mxu1 %v5958_v59  ;;  %2306 = vmatprep.subr.bf16.mxu0 %v5969_v62  ;;  %v6006_v59 = vld [vmem:[%s8345_s3 + $0x48] ss:$12 sps:$4 sm:$0xff]  }
 0x115   :  { %2279 = vmatprep.subr.bf16.mxu1 %v5966_v61  ;;  %v6014_v61 = vld [vmem:[%s8345_s3 + $0x34] ss:$12 sps:$4 sm:$0xff]  }
 0x116   :  { %v6017_v62 = vld [vmem:[%s8345_s3 + $0x1b4] ss:$12 sps:$4 sm:$0xff]  }
 0x117   :  { %2307 = vmatpush1.bf16.msra.mxu0 %v5967_v54  ;;  %v6020_v54 = vld [vmem:[%s8345_s3 + $0x1c] ss:$12 sps:$4 sm:$0xff]  }
 0x118   :  { %2280 = vmatpush2.bf16.msra.mxu1 %v5964_v0  ;;  %2308 = vmatprep.subr.bf16.mxu0 %v5975_v5  ;;  %v6012_v0 = vld [vmem:[%s8345_s3 + $0x30] ss:$12 sps:$4 sm:$0xff]   ;;  %v6021_v5 = vld [vmem:[%s8345_s3 + $0x198] ss:$12 sps:$4 sm:$0xff]  }
 0x119   :  { %2281 = vmatprep.subr.bf16.mxu1 %v5972_v4  ;;  %v6018_v4 = vld [vmem:[%s8345_s3 + $0x18] ss:$12 sps:$4 sm:$0xff]  }
 0x11b   :  { %2309 = vmatpush1.bf16.msra.mxu0 %v5973_v8  ;;  %v6024_v8 = vld [vmem:[%s8345_s3] ss:$12 sps:$4 sm:$0xff]  }
 0x11c   :  { %2282 = vmatpush2.bf16.msra.mxu1 %v5970_v7  ;;  %2310 = vmatprep.subr.bf16.mxu0 %v5981_v13  ;;  %v6029_v7 = vld [vmem:[%s8345_s3 + $0x184] ss:$12 sps:$4 sm:$0xff]   ;;  %v6030_v13 = vld [vmem:[%s8345_s3 + $0x168] ss:$12 sps:$4 sm:$0xff]  }
 0x11d   :  { %2283 = vmatprep.subr.bf16.mxu1 %v5978_v11  ;;  %v6035_v11 = vld [vmem:[%s8345_s3 + $0x2ec] ss:$12 sps:$4 sm:$0xff]  }
 0x11f   :  { %2311 = vmatpush1.bf16.msra.mxu0 %v5979_v16  ;;  %v6036_v16 = vld [vmem:[%s8345_s3 + $0x150] ss:$12 sps:$4 sm:$0xff]  }
 0x120   :  { %2284 = vmatpush2.bf16.msra.mxu1 %v5976_v15  ;;  %4312 = vmatprep.subr.bf16.mxu0 %v5984_v18  ;;  %v6038_v15 = vld [vmem:[%s8345_s3 + $0x154] ss:$12 sps:$4 sm:$0xff]   ;;  %v6039_v18 = vld [vmem:[%s8345_s3 + $0x2d0] ss:$12 sps:$4 sm:$0xff]  }
 0x121   :  { %4355 = vmatprep.subr.bf16.mxu1 %v5987_v19  ;;  %v6044_v19 = vld [vmem:[%s8345_s3 + $0x13c] ss:$12 sps:$4 sm:$0xff]  }
 0x122   :  { %v7381_v34 = vpop.f32.mrf.mxu0  ;;  %2329 = vmatmul.mubr.bf16.vlgmr.msra.gmra.mxu0 %v6532_v37  ;;  %v5994_v37 = vld [vmem:[%s8345_s3 + $0x78] ss:$12 sps:$4 sm:$0xff]  }
 0x123   :  { %v7379_v33 = vpop.f32.mrf.mxu1  ;;  %2286 = vmatmul.mubr.bf16.vlgmr.msra.gmra.mxu1 %v6647_v12  ;;  %4313 = vmatpush1.bf16.msra.mxu0 %v5982_v22  ;;  %v5999_v12 = vld [vmem:[%s8345_s3 + $0x1fc] ss:$12 sps:$4 sm:$0xff]  }
 0x124   :  { %4344 = vmatprep.mubr.bf16.mxu0 %v7368_v29  ;;  %4356 = vmatpush1.bf16.msra.mxu1 %v5985_v26  ;;  %v1988_v39 = vpop.f32.mrf.mxu0  ;;  %v6047_v22 = vld [vmem:[%s8345_s3 + $0x2bc] ss:$12 sps:$4 sm:$0xff]   ;;  %v6045_v26 = vld [vmem:[%s8345_s3 + $0x2b8] ss:$12 sps:$4 sm:$0xff]  }
 0x125   :  { %v1945_v38 = vpop.f32.mrf.mxu1  ;;  %4314 = vmatprep.subr.bf16.mxu0 %v5990_v27  ;;  %4357 = vmatprep.subr.bf16.mxu1 %v5993_v32  ;;  %v6050_v27 = vld [vmem:[%s8345_s3 + $0x124] ss:$12 sps:$4 sm:$0xff]   ;;  %v6056_v32 = vld [vmem:[%s8345_s3 + $0x10c] ss:$12 sps:$4 sm:$0xff]  }
 0x126   :  { %v1946_v40 = vadd.f32 %v1945_v38, %v338_v30  ;;  %v7400_v42 = vpop.f32.mrf.mxu0  ;;  %v6059_v38 = vld [vmem:[%s8345_s3 + $0x28c] ss:$12 sps:$4 sm:$0xff]  }
 0x127   :  { %v7398_v41 = vpop.f32.mrf.mxu1  ;;  %4315 = vmatpush1.bf16.msra.mxu0 %v5988_v31  ;;  %v6051_v31 = vld [vmem:[%s8345_s3 + $0x2a0] ss:$12 sps:$4 sm:$0xff]  }
 0x128   :  { %v1989_v44 = vadd.f32 %v1988_v39, %v1946_v40  ;;  %4358 = vmatpush1.bf16.msra.mxu1 %v5991_v35  ;;  %4316 = vmatprep.subr.bf16.mxu0 %v5996_v36  ;;  %v1992_v50 = vpop.f32.mrf.mxu0  ;;  %v7520_v35 = vsub.s32 2, %v7226_v20  ;;  %v6054_v36 = vld [vmem:[%s8345_s3 + $0x108] ss:$12 sps:$4 sm:$0xff]  }
 0x129   :  { %v1949_v45 = vpop.f32.mrf.mxu1  ;;  %4359 = vmatprep.subr.bf16.mxu1 %v5999_v12  ;;  %v6057_v39 = vld [vmem:[%s8345_s3 + $0x288] ss:$12 sps:$4 sm:$0xff]  }
 0x12a   :  { %v1950_v48 = vadd.f32 %v1949_v45, %v338_v30  ;;  %v2342_v55 = vmax.f32 %v1989_v44, 0.0  ;;  %v6053_v30 = vld [vmem:[%s8345_s3 + $0x2a4] ss:$12 sps:$4 sm:$0xff]   ;;  %v6062_v40 = vld [vmem:[%s8345_s3 + $0xf4] ss:$12 sps:$4 sm:$0xff]   ;;  %v334_v12 = vrot.slane %v7240_v24, %v7520_v35 }
 0x12b   :  { %4317 = vmatpush1.bf16.msra.mxu0 %v5994_v37  ;;  %v6065_v37 = vld [vmem:[%s8345_s3 + $0x274] ss:$12 sps:$4 sm:$0xff]   ;;  %v6063_v44 = vld [vmem:[%s8345_s3 + $0x270] ss:$12 sps:$4 sm:$0xff]  }
 0x12c   :  { %v1993_v2 = vadd.f32 %v1992_v50, %v1950_v48  ;;  %4360 = vmatpush1.bf16.msra.mxu1 %v5997_v43  ;;  %4318 = vmatprep.subr.bf16.mxu0 %v6002_v46  ;;  %v6060_v43 = vld [vmem:[%s8345_s3 + $0xf0] ss:$12 sps:$4 sm:$0xff]   ;;  %v1948_v46 = vadd.f32 %v7398_v41, %v334_v12  ;;  %v1944_v48 = vadd.f32 %v7379_v33, %v334_v12  ;;  %v6069_v50 = vld [vmem:[%s8345_s3 + $0x258] ss:$12 sps:$4 sm:$0xff]   ;;  %v6113_v12 = vld [vmem:[%s8345_s3 + $0x4b4] ss:$12 sps:$4 sm:$0xff]  }
 0x12d   :  { %4361 = vmatprep.subr.bf16.mxu1 %v6005_v47  ;;  %v6068_v45 = vld [vmem:[%s8345_s3 + $0xdc] ss:$12 sps:$4 sm:$0xff]   ;;  %v6074_v41 = vld [vmem:[%s8345_s3 + $0xc4] ss:$12 sps:$4 sm:$0xff]  }
 0x12e   :  { %v2354_v56 = vmax.f32 %v1993_v2, 0.0  ;;  %v6071_v47 = vld [vmem:[%s8345_s3 + $0x25c] ss:$12 sps:$4 sm:$0xff]   ;;  %v6077_v33 = vld [vmem:[%s8345_s3 + $0x244] ss:$12 sps:$4 sm:$0xff]  }
 0x12f   :  { %4319 = vmatpush1.bf16.msra.mxu0 %v6000_v49  ;;  %v6066_v49 = vld [vmem:[%s8345_s3 + $0xd8] ss:$12 sps:$4 sm:$0xff]   ;;  %v6072_v2 = vld [vmem:[%s8345_s3 + $0xc0] ss:$12 sps:$4 sm:$0xff]  }
 0x130   :  { %v7423_v57 = vpack.c.bf16 %v2354_v56, %v2342_v55  ;;  %4362 = vmatpush1.bf16.msra.mxu1 %v6003_v51  ;;  %4320 = vmatprep.subr.bf16.mxu0 %v6008_v52  ;;  %v1991_v51 = vadd.f32 %v7400_v42, %v1948_v46  ;;  %v1987_v52 = vadd.f32 %v7381_v34, %v1944_v48  ;;  %v6080_v42 = vld [vmem:[%s8345_s3 + $0x3ac] ss:$12 sps:$4 sm:$0xff]   ;;  %v6078_v34 = vld [vmem:[%s8345_s3 + $0x3a8] ss:$12 sps:$4 sm:$0xff]  }
 0x131   :  { %4363 = vmatprep.subr.bf16.mxu1 %v6011_v53  ;;  %v6075_v53 = vld [vmem:[%s8345_s3 + $0x240] ss:$12 sps:$4 sm:$0xff]   ;;  %v6119_v46 = vld [vmem:[%s8345_s3 + $0x49c] ss:$12 sps:$4 sm:$0xff]   ;;  %v6117_v48 = vld [vmem:[%s8345_s3 + $0x498] ss:$12 sps:$4 sm:$0xff]  }
 0x132   :  { %4387 = vmatprep.mubr.bf16.mxu1 %v7423_v57  ;;  %v6083_v55 = vld [vmem:[%s8345_s3 + $0x52c] ss:$12 sps:$4 sm:$0xff]   ;;  %v2353_v56 = vmax.f32 %v1991_v51, 0.0 }
 0x133   :  { %4321 = vmatpush1.bf16.msra.mxu0 %v6006_v59  ;;  %v345_v59 = vsub.s32 5, %v7226_v20  ;;  %v6123_v51 = vld [vmem:[%s8345_s3 + $0x480] ss:$12 sps:$4 sm:$0xff]  }
 0x134   :  { %4364 = vmatpush1.bf16.msra.mxu1 %v6009_v60  ;;  %4322 = vmatprep.subr.bf16.mxu0 %v6014_v61  ;;  %v6081_v61 = vld [vmem:[%s8345_s3 + $0x528] ss:$12 sps:$4 sm:$0xff]  }
 0x135   :  { %4365 = vmatprep.subr.bf16.mxu1 %v6017_v62  ;;  %v2341_v62 = vmax.f32 %v1987_v52, 0.0  ;;  %v353_v52 = vsub.s32 7, %v7226_v20 }
 0x137   :  { %4323 = vmatpush1.bf16.msra.mxu0 %v6012_v0  ;;  %v6086_v0 = vld [vmem:[%s8345_s3 + $0x394] ss:$12 sps:$4 sm:$0xff]  }
 0x138   :  { %4366 = vmatpush1.bf16.msra.mxu1 %v6015_v1  ;;  %4324 = vmatprep.subr.bf16.mxu0 %v6020_v54  ;;  %v7591_v1 = vpack.c.bf16 %v2353_v56, %v2341_v62  ;;  %v346_v54 = vrot.slane %v7240_v24, %v345_v59  ;;  %v6366_v56 = vld [vmem:[%s8344_s2] sm:$0xff] }
 0x139   :  { %4367 = vmatprep.subr.bf16.mxu1 %v6023_v3  ;;  %v6084_v3 = vld [vmem:[%s8345_s3 + $0x390] ss:$12 sps:$4 sm:$0xff]   ;;  %v354_v59 = vrot.slane %v6366_v56, %v353_v52 }
 0x13b   :  { %4325 = vmatpush1.bf16.msra.mxu0 %v6018_v4  ;;  %v6089_v4 = vld [vmem:[%s8345_s3 + $0x514] ss:$12 sps:$4 sm:$0xff]  }
 0x13c   :  { %4368 = vmatpush1.bf16.msra.mxu1 %v6021_v5  ;;  %4326 = vmatprep.subr.bf16.mxu0 %v6026_v6 }
 0x13d   :  { %4369 = vmatprep.subr.bf16.mxu1 %v6029_v7  ;;  %v6087_v7 = vld [vmem:[%s8345_s3 + $0x510] ss:$12 sps:$4 sm:$0xff]  }
 0x13f   :  { %4327 = vmatpush1.bf16.msra.mxu0 %v6024_v8  ;;  %v6092_v8 = vld [vmem:[%s8345_s3 + $0x37c] ss:$12 sps:$4 sm:$0xff]  }
 0x140   :  { %4370 = vmatpush1.bf16.msra.mxu1 %v6027_v9  ;;  %4328 = vmatprep.subr.bf16.mxu0 %v6032_v10  ;;  %v6095_v10 = vld [vmem:[%s8345_s3 + $0x4fc] ss:$12 sps:$4 sm:$0xff]  }
 0x141   :  { %4371 = vmatprep.subr.bf16.mxu1 %v6035_v11 }
 0x143   :  { %4329 = vmatpush2.bf16.msra.mxu0 %v6030_v13  ;;  %v7583_v60 = vpop.f32.mrf.mxu1 }
 0x144   :  { %4372 = vmatpush2.bf16.msra.mxu1 %v6033_v14  ;;  %4330 = vmatprep.subr.bf16.mxu0 %v6038_v15  ;;  %v6090_v14 = vld [vmem:[%s8345_s3 + $0x378] ss:$12 sps:$4 sm:$0xff]  }
 0x145   :  { %4373 = vmatprep.subr.bf16.mxu1 %v6041_v17  ;;  %v2074_v5 = vpop.f32.mrf.mxu1  ;;  %v6093_v15 = vld [vmem:[%s8345_s3 + $0x4f8] ss:$12 sps:$4 sm:$0xff]  }
 0x146   :  { %v6098_v17 = vld [vmem:[%s8345_s3 + $0x364] ss:$12 sps:$4 sm:$0xff]  }
 0x147   :  { %4331 = vmatpush2.bf16.msra.mxu0 %v6036_v16  ;;  %v7613_v11 = vpop.f32.mrf.mxu1 }
 0x148   :  { %4374 = vmatpush2.bf16.msra.mxu1 %v6039_v18  ;;  %4332 = vmatprep.subr.bf16.mxu0 %v6044_v19 }
 0x149   :  { %4375 = vmatprep.subr.bf16.mxu1 %v6047_v22  ;;  %v2078_v22 = vpop.f32.mrf.mxu1 }
 0x14b   :  { %4333 = vmatpush2.bf16.msra.mxu0 %v6042_v21  ;;  %v6101_v21 = vld [vmem:[%s8345_s3 + $0x4e4] ss:$12 sps:$4 sm:$0xff]  }
 0x14c   :  { %4376 = vmatpush2.bf16.msra.mxu1 %v6045_v26  ;;  %4334 = vmatprep.subr.bf16.mxu0 %v6050_v27  ;;  %v6096_v26 = vld [vmem:[%s8345_s3 + $0x360] ss:$12 sps:$4 sm:$0xff]  }
 0x14d   :  { %4377 = vmatprep.subr.bf16.mxu1 %v6053_v30  ;;  %v6104_v30 = vld [vmem:[%s8345_s3 + $0x34c] ss:$12 sps:$4 sm:$0xff]  }
 0x14f   :  { %4335 = vmatpush2.bf16.msra.mxu0 %v6048_v28  ;;  %v6099_v28 = vld [vmem:[%s8345_s3 + $0x4e0] ss:$12 sps:$4 sm:$0xff]  }
 0x150   :  { %4378 = vmatpush2.bf16.msra.mxu1 %v6051_v31  ;;  %4336 = vmatprep.subr.bf16.mxu0 %v6056_v32 }
 0x151   :  { %4379 = vmatprep.subr.bf16.mxu1 %v6059_v38  ;;  %v6107_v38 = vld [vmem:[%s8345_s3 + $0x4cc] ss:$12 sps:$4 sm:$0xff]  }
 0x153   :  { %4337 = vmatpush2.bf16.msra.mxu0 %v6054_v36  ;;  %v6102_v36 = vld [vmem:[%s8345_s3 + $0x348] ss:$12 sps:$4 sm:$0xff]  }
 0x154   :  { %4380 = vmatpush2.bf16.msra.mxu1 %v6057_v39  ;;  %4338 = vmatprep.subr.bf16.mxu0 %v6062_v40  ;;  %v6105_v39 = vld [vmem:[%s8345_s3 + $0x4c8] ss:$12 sps:$4 sm:$0xff]  }
 0x155   :  { %4381 = vmatprep.subr.bf16.mxu1 %v6065_v37  ;;  %v6110_v37 = vld [vmem:[%s8345_s3 + $0x334] ss:$12 sps:$4 sm:$0xff]  }
 0x157   :  { %4339 = vmatpush2.bf16.msra.mxu0 %v6060_v43  ;;  %v6108_v43 = vld [vmem:[%s8345_s3 + $0x330] ss:$12 sps:$4 sm:$0xff]  }
 0x158   :  { %4382 = vmatpush2.bf16.msra.mxu1 %v6063_v44  ;;  %4340 = vmatprep.subr.bf16.mxu0 %v6068_v45  ;;  %v6111_v44 = vld [vmem:[%s8345_s3 + $0x4b0] ss:$12 sps:$4 sm:$0xff]  }
 0x159   :  { %4383 = vmatprep.subr.bf16.mxu1 %v6071_v47  ;;  %v6116_v45 = vld [vmem:[%s8345_s3 + $0x31c] ss:$12 sps:$4 sm:$0xff]   ;;  %v6114_v47 = vld [vmem:[%s8345_s3 + $0x318] ss:$12 sps:$4 sm:$0xff]  }
 0x15b   :  { %4341 = vmatpush2.bf16.msra.mxu0 %v6066_v49  ;;  %v6122_v49 = vld [vmem:[%s8345_s3 + $0x304] ss:$12 sps:$4 sm:$0xff]  }
 0x15c   :  { %4384 = vmatpush2.bf16.msra.mxu1 %v6069_v50  ;;  %4342 = vmatprep.subr.bf16.mxu0 %v6074_v41  ;;  %v6125_v50 = vld [vmem:[%s8345_s3 + $0x484] ss:$12 sps:$4 sm:$0xff]   ;;  %v6120_v41 = vld [vmem:[%s8345_s3 + $0x300] ss:$12 sps:$4 sm:$0xff]  }
 0x15d   :  { %4385 = vmatprep.subr.bf16.mxu1 %v6077_v33  ;;  %v6128_v33 = vld [vmem:[%s8345_s3 + $0x46c] ss:$12 sps:$4 sm:$0xff]  }
 0x15f   :  { %4343 = vmatpush2.bf16.msra.mxu0 %v6072_v2  ;;  %v6131_v2 = vld [vmem:[%s8345_s3 + $0x5ec] ss:$12 sps:$4 sm:$0xff]  }
 0x160   :  { %4386 = vmatpush2.bf16.msra.mxu1 %v6075_v53  ;;  %4398 = vmatprep.subr.bf16.mxu0 %v6080_v42  ;;  %v6126_v53 = vld [vmem:[%s8345_s3 + $0x468] ss:$12 sps:$4 sm:$0xff]  }
 0x161   :  { %4441 = vmatprep.subr.bf16.mxu1 %v6083_v55  ;;  %v6129_v42 = vld [vmem:[%s8345_s3 + $0x5e8] ss:$12 sps:$4 sm:$0xff]  }
 0x162   :  { %v7600_v6 = vpop.f32.mrf.mxu0  ;;  %4345 = vmatmul.mubr.bf16.vlgmr.msra.gmra.mxu0 %v7303_v58  ;;  %v6134_v55 = vld [vmem:[%s8345_s3 + $0x454] ss:$12 sps:$4 sm:$0xff]  }
 0x163   :  { %4388 = vmatmul.mubr.bf16.vlgmr.msra.gmra.mxu1 %v7591_v1  ;;  %4399 = vmatpush1.bf16.msra.mxu0 %v6078_v34  ;;  %v6137_v34 = vld [vmem:[%s8345_s3 + $0x5d4] ss:$12 sps:$4 sm:$0xff]  }
 0x164   :  { %4442 = vmatpush1.bf16.msra.mxu1 %v6081_v61  ;;  %v2031_v24 = vpop.f32.mrf.mxu0  ;;  %4400 = vmatprep.subr.bf16.mxu0 %v6086_v0  ;;  %v6132_v0 = vld [vmem:[%s8345_s3 + $0x450] ss:$12 sps:$4 sm:$0xff]  }
 0x165   :  { %v2032_v9 = vadd.f32 %v2031_v24, %v346_v54  ;;  %4443 = vmatprep.subr.bf16.mxu1 %v6089_v4  ;;  %v6135_v4 = vld [vmem:[%s8345_s3 + $0x5d0] ss:$12 sps:$4 sm:$0xff]  }
 0x166   :  { %v7615_v13 = vpop.f32.mrf.mxu0  ;;  %v6143_v24 = vld [vmem:[%s8345_s3 + $0x5bc] ss:$12 sps:$4 sm:$0xff]  }
 0x167   :  { %4401 = vmatpush1.bf16.msra.mxu0 %v6084_v3  ;;  %v2075_v18 = vadd.f32 %v2074_v5, %v2032_v9  ;;  %v6140_v5 = vld [vmem:[%s8345_s3 + $0x43c] ss:$12 sps:$4 sm:$0xff]  }
 0x168   :  { %4444 = vmatpush1.bf16.msra.mxu1 %v6087_v7  ;;  %v2035_v16 = vpop.f32.mrf.mxu0  ;;  %4402 = vmatprep.subr.bf16.mxu0 %v6092_v8 }
 0x169   :  { %v2036_v19 = vadd.f32 %v2035_v16, %v346_v54  ;;  %4445 = vmatprep.subr.bf16.mxu1 %v6095_v10  ;;  %v2344_v31 = vmax.f32 %v2075_v18, 0.0  ;;  %v6138_v10 = vld [vmem:[%s8345_s3 + $0x438] ss:$12 sps:$4 sm:$0xff]  }
 0x16a   :  { %v6146_v16 = vld [vmem:[%s8345_s3 + $0x424] ss:$12 sps:$4 sm:$0xff]  }
 0x16b   :  { %v2079_v27 = vadd.f32 %v2078_v22, %v2036_v19  ;;  %4403 = vmatpush1.bf16.msra.mxu0 %v6090_v14  ;;  %v6141_v14 = vld [vmem:[%s8345_s3 + $0x5b8] ss:$12 sps:$4 sm:$0xff]   ;;  %v349_v22 = vsub.s32 6, %v7226_v20 }
 0x16c   :  { %4446 = vmatpush1.bf16.msra.mxu1 %v6093_v15  ;;  %4404 = vmatprep.subr.bf16.mxu0 %v6098_v17  ;;  %v6149_v19 = vld [vmem:[%s8345_s3 + $0x5a4] ss:$12 sps:$4 sm:$0xff]  }
 0x16d   :  { %v2356_v32 = vmax.f32 %v2079_v27, 0.0  ;;  %4447 = vmatprep.subr.bf16.mxu1 %v6101_v21  ;;  %v341_v21 = vsub.s32 4, %v7226_v20 }
 0x16f   :  { %4405 = vmatpush1.bf16.msra.mxu0 %v6096_v26  ;;  %v7647_v40 = vpack.c.bf16 %v2356_v32, %v2344_v31  ;;  %v6152_v31 = vld [vmem:[%s8345_s3 + $0x40c] ss:$12 sps:$4 sm:$0xff]  }
 0x170   :  { %4448 = vmatpush1.bf16.msra.mxu1 %v6099_v28  ;;  %4406 = vmatprep.subr.bf16.mxu0 %v6104_v30  ;;  %v6144_v28 = vld [vmem:[%s8345_s3 + $0x420] ss:$12 sps:$4 sm:$0xff]  }
 0x171   :  { %4430 = vmatprep.mubr.bf16.mxu0 %v7647_v40  ;;  %4449 = vmatprep.subr.bf16.mxu1 %v6107_v38  ;;  %v6147_v30 = vld [vmem:[%s8345_s3 + $0x5a0] ss:$12 sps:$4 sm:$0xff]   ;;  %v6150_v38 = vld [vmem:[%s8345_s3 + $0x408] ss:$12 sps:$4 sm:$0xff]  }
 0x173   :  { %4407 = vmatpush1.bf16.msra.mxu0 %v6102_v36 }
 0x174   :  { %4450 = vmatpush1.bf16.msra.mxu1 %v6105_v39  ;;  %4408 = vmatprep.subr.bf16.mxu0 %v6110_v37  ;;  %v6155_v39 = vld [vmem:[%s8345_s3 + $0x58c] ss:$12 sps:$4 sm:$0xff]   ;;  %v6153_v37 = vld [vmem:[%s8345_s3 + $0x588] ss:$12 sps:$4 sm:$0xff]  }
 0x175   :  { %4451 = vmatprep.subr.bf16.mxu1 %v6113_v12 }
 0x177   :  { %4409 = vmatpush1.bf16.msra.mxu0 %v6108_v43  ;;  %v6158_v43 = vld [vmem:[%s8345_s3 + $0x3f4] ss:$12 sps:$4 sm:$0xff]  }
 0x178   :  { %4452 = vmatpush1.bf16.msra.mxu1 %v6111_v44  ;;  %4410 = vmatprep.subr.bf16.mxu0 %v6116_v45  ;;  %v6161_v44 = vld [vmem:[%s8345_s3 + $0x574] ss:$12 sps:$4 sm:$0xff]   ;;  %v342_v45 = vrot.slane %v6366_v56, %v341_v21 }
 0x179   :  { %4453 = vmatprep.subr.bf16.mxu1 %v6119_v46  ;;  %v350_v46 = vrot.slane %v6366_v56, %v349_v22 }
 0x17b   :  { %4411 = vmatpush1.bf16.msra.mxu0 %v6114_v47  ;;  %v6156_v47 = vld [vmem:[%s8345_s3 + $0x3f0] ss:$12 sps:$4 sm:$0xff]  }
 0x17c   :  { %4454 = vmatpush1.bf16.msra.mxu1 %v6117_v48  ;;  %4412 = vmatprep.subr.bf16.mxu0 %v6122_v49 }
 0x17d   :  { %4455 = vmatprep.subr.bf16.mxu1 %v6125_v50 }
 0x17f   :  { %4413 = vmatpush1.bf16.msra.mxu0 %v6120_v41 }
 0x180   :  { %4456 = vmatpush1.bf16.msra.mxu1 %v6123_v51  ;;  %4414 = vmatprep.subr.bf16.mxu0 %v6128_v33 }
 0x181   :  { %4457 = vmatprep.subr.bf16.mxu1 %v6131_v2 }
 0x182   :  { %v7710_v62 = vpop.f32.mrf.mxu0 }
 0x183   :  { %v7708_v61 = vpop.f32.mrf.mxu1  ;;  %4415 = vmatpush2.bf16.msra.mxu0 %v6126_v53 }
 0x184   :  { %4458 = vmatpush2.bf16.msra.mxu1 %v6129_v42  ;;  %v2160_v3 = vpop.f32.mrf.mxu0  ;;  %4416 = vmatprep.subr.bf16.mxu0 %v6134_v55 }
 0x185   :  { %v2117_v54 = vpop.f32.mrf.mxu1  ;;  %4459 = vmatprep.subr.bf16.mxu1 %v6137_v34 }
 0x186   :  { %v2118_v7 = vadd.f32 %v2117_v54, %v354_v59  ;;  %v2162_v9 = vpop.f32.mrf.mxu0 }
 0x187   :  { %v2119_v8 = vpop.f32.mrf.mxu1  ;;  %4417 = vmatpush2.bf16.msra.mxu0 %v6132_v0 }
 0x188   :  { %4460 = vmatpush2.bf16.msra.mxu1 %v6135_v4  ;;  %4418 = vmatprep.subr.bf16.mxu0 %v6140_v5  ;;  %v2161_v17 = vadd.f32 %v2160_v3, %v2118_v7  ;;  %v2164_v26 = vpop.f32.mrf.mxu0 }
 0x189   :  { %v2121_v15 = vpop.f32.mrf.mxu1  ;;  %4461 = vmatprep.subr.bf16.mxu1 %v6143_v24 }
 0x18a   :  { %v2122_v18 = vadd.f32 %v2121_v15, %v354_v59  ;;  %v2346_v32 = vmax.f32 %v2161_v17, 0.0 }
 0x18b   :  { %4419 = vmatpush2.bf16.msra.mxu0 %v6138_v10 }
 0x18c   :  { %v2165_v27 = vadd.f32 %v2164_v26, %v2122_v18  ;;  %4462 = vmatpush2.bf16.msra.mxu1 %v6141_v14  ;;  %4420 = vmatprep.subr.bf16.mxu0 %v6146_v16 }
 0x18d   :  { %4463 = vmatprep.subr.bf16.mxu1 %v6149_v19 }
 0x18e   :  { %v2358_v36 = vmax.f32 %v2165_v27, 0.0 }
 0x18f   :  { %4421 = vmatpush2.bf16.msra.mxu0 %v6144_v28 }
 0x190   :  { %v7756_v12 = vpack.c.bf16 %v2358_v36, %v2346_v32  ;;  %4464 = vmatpush2.bf16.msra.mxu1 %v6147_v30  ;;  %4422 = vmatprep.subr.bf16.mxu0 %v6152_v31 }
 0x191   :  { %4465 = vmatprep.subr.bf16.mxu1 %v6155_v39 }
 0x192   :  { %4473 = vmatprep.mubr.bf16.mxu1 %v7756_v12 }
 0x193   :  { %4423 = vmatpush2.bf16.msra.mxu0 %v6150_v38 }
 0x194   :  { %10 = vsyncpa [#allocation3], 0  ;;  %v2034_v48 = vadd.f32 %v7615_v13, %v342_v45  ;;  %4466 = vmatpush2.bf16.msra.mxu1 %v6153_v37  ;;  %4424 = vmatprep.subr.bf16.mxu0 %v6158_v43  ;;  %v6159_v49 = vld [vmem:[%s8345_s3 + $0x570] ss:$12 sps:$4 sm:$0xff]   ;;  %v2120_v41 = vadd.f32 %v2119_v8, %v350_v46  ;;  %v2030_v33 = vadd.f32 %v7600_v6, %v342_v45  ;;  %v6162_v2 = vld [vmem:[%s8345_s3 + $0x3d8] ss:$12 sps:$4 sm:$0xff]  }
 0x195   :  { %v6164_v50 = vld [vmem:[%s8345_s3 + $0x3dc] ss:$12 sps:$4 sm:$0xff]   ;;  %4467 = vmatprep.subr.bf16.mxu1 %v6161_v44  ;;  %v2116_v13 = vadd.f32 %v7708_v61, %v350_v46  ;;  %v6165_v53 = vld [vmem:[%s8345_s3 + $0x558] ss:$12 sps:$4 sm:$0xff]   ;;  %v6168_v59 = vld [vmem:[%s8345_s3 + $0x3c0] ss:$12 sps:$4 sm:$0xff]  }
 0x196   :  { %v6167_v51 = vld [vmem:[%s8345_s3 + $0x55c] ss:$12 sps:$4 sm:$0xff]   ;;  %v2077_v52 = vadd.f32 %v7613_v11, %v2034_v48  ;;  %v6170_v42 = vld [vmem:[%s8345_s3 + $0x3c4] ss:$12 sps:$4 sm:$0xff]   ;;  %v2163_v6 = vadd.f32 %v2162_v9, %v2120_v41  ;;  %v2073_v56 = vadd.f32 %v7583_v60, %v2030_v33  ;;  %v6171_v61 = vld [vmem:[%s8345_s3 + $0x540] ss:$12 sps:$4 sm:$0xff]  }
 0x197   :  { %4425 = vmatpush2.bf16.msra.mxu0 %v6156_v47  ;;  %v6173_v55 = vld [vmem:[%s8345_s3 + $0x544] ss:$12 sps:$4 sm:$0xff]   ;;  %v2159_v11 = vadd.f32 %v7710_v62, %v2116_v13  ;;  %v6176_v0 = vld [vmem:[%s8345_s3 + $0x6ac] ss:$12 sps:$4 sm:$0xff]   ;;  %v6174_v4 = vld [vmem:[%s8345_s3 + $0x6a8] ss:$12 sps:$4 sm:$0xff]  }
 0x198   :  { %4468 = vmatpush2.bf16.msra.mxu1 %v6159_v49  ;;  %4426 = vmatprep.subr.bf16.mxu0 %v6164_v50  ;;  %v2355_v34 = vmax.f32 %v2077_v52, 0.0  ;;  %v2357_v54 = vmax.f32 %v2163_v6, 0.0  ;;  %v6188_v60 = vld [vmem:[%s8345_s3 + $0x82c] ss:$12 sps:$4 sm:$0xff]   ;;  %v2343_v62 = vmax.f32 %v2073_v56, 0.0 }
 0x199   :  { %4469 = vmatprep.subr.bf16.mxu1 %v6167_v51  ;;  %v2345_v3 = vmax.f32 %v2159_v11, 0.0  ;;  %v6179_v7 = vld [vmem:[%s8345_s3 + $0x694] ss:$12 sps:$4 sm:$0xff]   ;;  %v6177_v10 = vld [vmem:[%s8345_s3 + $0x690] ss:$12 sps:$4 sm:$0xff]  }
 0x19a   :  { %v7810_v5 = vpack.c.bf16 %v2355_v34, %v2343_v62  ;;  %v6186_v24 = vld [vmem:[%s8345_s3 + $0x828] ss:$12 sps:$4 sm:$0xff]   ;;  %v6192_v15 = vld [vmem:[%s8345_s3 + $0x810] ss:$12 sps:$4 sm:$0xff]   ;;  %v6180_v17 = vld [vmem:[%s8345_s3 + $0x678] ss:$12 sps:$4 sm:$0xff]  }
 0x19b   :  { %4427 = vmatpush2.bf16.msra.mxu0 %v6162_v2  ;;  %v7818_v8 = vpack.c.bf16 %v2357_v54, %v2345_v3  ;;  %v6194_v9 = vld [vmem:[%s8345_s3 + $0x814] ss:$12 sps:$4 sm:$0xff]   ;;  %v6182_v14 = vld [vmem:[%s8345_s3 + $0x67c] ss:$12 sps:$4 sm:$0xff]   ;;  %v6185_v18 = vld [vmem:[%s8345_s3 + $0x664] ss:$12 sps:$4 sm:$0xff]  }
 0x19c   :  { %4470 = vmatpush2.bf16.msra.mxu1 %v6165_v53  ;;  %4428 = vmatprep.subr.bf16.mxu0 %v6170_v42  ;;  %v6200_v16 = vld [vmem:[%s8345_s3 + $0x7fc] ss:$12 sps:$4 sm:$0xff]   ;;  %v6198_v19 = vld [vmem:[%s8345_s3 + $0x7f8] ss:$12 sps:$4 sm:$0xff]   ;;  %v6183_v22 = vld [vmem:[%s8345_s3 + $0x660] ss:$12 sps:$4 sm:$0xff]  }
 0x19d   :  { %4471 = vmatprep.subr.bf16.mxu1 %v6173_v55  ;;  %v6206_v21 = vld [vmem:[%s8345_s3 + $0x7e4] ss:$12 sps:$4 sm:$0xff]   ;;  %v6191_v26 = vld [vmem:[%s8345_s3 + $0x64c] ss:$12 sps:$4 sm:$0xff]   ;;  %v6189_v30 = vld [vmem:[%s8345_s3 + $0x648] ss:$12 sps:$4 sm:$0xff]  }
 0x19e   :  { %v6204_v27 = vld [vmem:[%s8345_s3 + $0x7e0] ss:$12 sps:$4 sm:$0xff]   ;;  %v6210_v32 = vld [vmem:[%s8345_s3 + $0x7c8] ss:$12 sps:$4 sm:$0xff]   ;;  %v6195_v38 = vld [vmem:[%s8345_s3 + $0x630] ss:$12 sps:$4 sm:$0xff]  }
 0x19f   :  { %4429 = vmatpush2.bf16.msra.mxu0 %v6168_v59  ;;  %v6212_v28 = vld [vmem:[%s8345_s3 + $0x7cc] ss:$12 sps:$4 sm:$0xff]   ;;  %v6197_v31 = vld [vmem:[%s8345_s3 + $0x634] ss:$12 sps:$4 sm:$0xff]   ;;  %v6203_v39 = vld [vmem:[%s8345_s3 + $0x61c] ss:$12 sps:$4 sm:$0xff]  }
 0x1a0   :  { %4472 = vmatpush2.bf16.msra.mxu1 %v6171_v61  ;;  %4484 = vmatprep.subr.bf16.mxu0 %v6176_v0  ;;  %v6218_v36 = vld [vmem:[%s8345_s3 + $0x7b4] ss:$12 sps:$4 sm:$0xff]   ;;  %v6216_v37 = vld [vmem:[%s8345_s3 + $0x7b0] ss:$12 sps:$4 sm:$0xff]   ;;  %v6201_v44 = vld [vmem:[%s8345_s3 + $0x618] ss:$12 sps:$4 sm:$0xff]  }
 0x1a1   :  { %4527 = vmatprep.subr.bf16.mxu1 %v6188_v60  ;;  %v6224_v43 = vld [vmem:[%s8345_s3 + $0x79c] ss:$12 sps:$4 sm:$0xff]   ;;  %v6209_v45 = vld [vmem:[%s8345_s3 + $0x604] ss:$12 sps:$4 sm:$0xff]   ;;  %v6207_v48 = vld [vmem:[%s8345_s3 + $0x600] ss:$12 sps:$4 sm:$0xff]  }
 0x1a2   :  { %4431 = vmatmul.mubr.bf16.vlgmr.msra.gmra.mxu0 %v7810_v5  ;;  %v6222_v46 = vld [vmem:[%s8345_s3 + $0x798] ss:$12 sps:$4 sm:$0xff]   ;;  %v6228_v50 = vld [vmem:[%s8345_s3 + $0x780] ss:$12 sps:$4 sm:$0xff]   ;;  %v6213_v33 = vld [vmem:[%s8345_s3 + $0x768] ss:$12 sps:$4 sm:$0xff]  }
 0x1a3   :  { %4474 = vmatmul.mubr.bf16.vlgmr.msra.gmra.mxu1 %v7818_v8  ;;  %4485 = vmatpush1.bf16.msra.mxu0 %v6174_v4  ;;  %v6230_v47 = vld [vmem:[%s8345_s3 + $0x784] ss:$12 sps:$4 sm:$0xff]   ;;  %v6215_v49 = vld [vmem:[%s8345_s3 + $0x76c] ss:$12 sps:$4 sm:$0xff]   ;;  %v7909_v51 = vpop.f32.mrf.mxu1  ;;  %v7917_v13 = vld [vmem:[%s8344_s2 + $0x8] sm:$0xf] }
 0x1a4   :  { %4486 = vmatprep.subr.bf16.mxu0 %v6179_v7  ;;  %4528 = vmatpush1.bf16.msra.mxu1 %v6186_v24  ;;  %v6236_v41 = vld [vmem:[%s8345_s3 + $0x8ec] ss:$12 sps:$4 sm:$0xff]   ;;  %v6221_v2 = vld [vmem:[%s8345_s3 + $0x754] ss:$12 sps:$4 sm:$0xff]   ;;  %v362_v53 = vrot.slane %v7917_v13, %v7318_v63  ;;  %v6219_v56 = vld [vmem:[%s8345_s3 + $0x750] ss:$12 sps:$4 sm:$0xff]  }
 0x1a5   :  { %4529 = vmatprep.subr.bf16.mxu1 %v6194_v9  ;;  %v6234_v52 = vld [vmem:[%s8345_s3 + $0x8e8] ss:$12 sps:$4 sm:$0xff]   ;;  %v2246_v6 = vpop.f32.mrf.mxu1  ;;  %v6240_v34 = vld [vmem:[%s8345_s3 + $0x8d0] ss:$12 sps:$4 sm:$0xff]   ;;  %v6225_v62 = vld [vmem:[%s8345_s3 + $0x738] ss:$12 sps:$4 sm:$0xff]  }
 0x1a6   :  { %v6242_v42 = vld [vmem:[%s8345_s3 + $0x8d4] ss:$12 sps:$4 sm:$0xff]   ;;  %v6227_v59 = vld [vmem:[%s8345_s3 + $0x73c] ss:$12 sps:$4 sm:$0xff]   ;;  %v6233_v4 = vld [vmem:[%s8345_s3 + $0x724] ss:$12 sps:$4 sm:$0xff]  }
 0x1a7   :  { %4487 = vmatpush1.bf16.msra.mxu0 %v6177_v10  ;;  %v6248_v0 = vld [vmem:[%s8345_s3 + $0x8bc] ss:$12 sps:$4 sm:$0xff]   ;;  %v2248_v54 = vpop.f32.mrf.mxu1  ;;  %v6246_v7 = vld [vmem:[%s8345_s3 + $0x8b8] ss:$12 sps:$4 sm:$0xff]   ;;  %v6271_v20 = vld [vmem:[%s8345_s3 + $0x140] ss:$12 sps:$4 sm:$0xff]  }
 0x1a8   :  { %4488 = vmatprep.subr.bf16.mxu0 %v6182_v14  ;;  %4530 = vmatpush1.bf16.msra.mxu1 %v6192_v15  ;;  %v6254_v10 = vld [vmem:[%s8345_s3 + $0x8a4] ss:$12 sps:$4 sm:$0xff]  }
 0x1a9   :  { %4531 = vmatprep.subr.bf16.mxu1 %v6200_v16  ;;  %v2250_v14 = vpop.f32.mrf.mxu1  ;;  %v6231_v16 = vld [vmem:[%s8345_s3 + $0x720] ss:$12 sps:$4 sm:$0xff]  }
 0x1ab   :  { %4489 = vmatpush1.bf16.msra.mxu0 %v6180_v17  ;;  %v6239_v17 = vld [vmem:[%s8345_s3 + $0x70c] ss:$12 sps:$4 sm:$0xff]  }
 0x1ac   :  { %4490 = vmatprep.subr.bf16.mxu0 %v6185_v18  ;;  %4532 = vmatpush1.bf16.msra.mxu1 %v6198_v19  ;;  %v6252_v18 = vld [vmem:[%s8345_s3 + $0x8a0] ss:$12 sps:$4 sm:$0xff]  }
 0x1ad   :  { %4533 = vmatprep.subr.bf16.mxu1 %v6206_v21 }
 0x1af   :  { %4491 = vmatpush1.bf16.msra.mxu0 %v6183_v22  ;;  %v6260_v22 = vld [vmem:[%s8345_s3 + $0x88c] ss:$12 sps:$4 sm:$0xff]  }
 0x1b0   :  { %4492 = vmatprep.subr.bf16.mxu0 %v6191_v26  ;;  %4534 = vmatpush1.bf16.msra.mxu1 %v6204_v27  ;;  %v6237_v27 = vld [vmem:[%s8345_s3 + $0x708] ss:$12 sps:$4 sm:$0xff]  }
 0x1b1   :  { %4535 = vmatprep.subr.bf16.mxu1 %v6212_v28  ;;  %v6245_v28 = vld [vmem:[%s8345_s3 + $0x6f4] ss:$12 sps:$4 sm:$0xff]  }
 0x1b3   :  { %4493 = vmatpush1.bf16.msra.mxu0 %v6189_v30  ;;  %v6258_v30 = vld [vmem:[%s8345_s3 + $0x888] ss:$12 sps:$4 sm:$0xff]  }
 0x1b4   :  { %4494 = vmatprep.subr.bf16.mxu0 %v6197_v31  ;;  %4536 = vmatpush1.bf16.msra.mxu1 %v6210_v32  ;;  %v6265_v31 = vld [vmem:[%s8345_s3 + $0x874] ss:$12 sps:$4 sm:$0xff]   ;;  %v358_v32 = vrot.slane %v7917_v13, %v7243_v25 }
 0x1b5   :  { %4537 = vmatprep.subr.bf16.mxu1 %v6218_v36  ;;  %v6243_v36 = vld [vmem:[%s8345_s3 + $0x6f0] ss:$12 sps:$4 sm:$0xff]  }
 0x1b7   :  { %4495 = vmatpush1.bf16.msra.mxu0 %v6195_v38 }
 0x1b8   :  { %4496 = vmatprep.subr.bf16.mxu0 %v6203_v39  ;;  %4538 = vmatpush1.bf16.msra.mxu1 %v6216_v37  ;;  %v6251_v39 = vld [vmem:[%s8345_s3 + $0x6dc] ss:$12 sps:$4 sm:$0xff]  }
 0x1b9   :  { %4539 = vmatprep.subr.bf16.mxu1 %v6224_v43  ;;  %v6263_v37 = vld [vmem:[%s8345_s3 + $0x870] ss:$12 sps:$4 sm:$0xff]  }
 0x1ba   :  { %v6270_v43 = vld [vmem:[%s8345_s3 + $0x85c] ss:$12 sps:$4 sm:$0xff]  }
 0x1bb   :  { %4497 = vmatpush1.bf16.msra.mxu0 %v6201_v44 }
 0x1bc   :  { %4498 = vmatprep.subr.bf16.mxu0 %v6209_v45  ;;  %4540 = vmatpush1.bf16.msra.mxu1 %v6222_v46  ;;  %v6249_v45 = vld [vmem:[%s8345_s3 + $0x6d8] ss:$12 sps:$4 sm:$0xff]  }
 0x1bd   :  { %4541 = vmatprep.subr.bf16.mxu1 %v6230_v47  ;;  %v6257_v47 = vld [vmem:[%s8345_s3 + $0x6c4] ss:$12 sps:$4 sm:$0xff]  }
 0x1bf   :  { %4499 = vmatpush1.bf16.msra.mxu0 %v6207_v48  ;;  %v6268_v48 = vld [vmem:[%s8345_s3 + $0x858] ss:$12 sps:$4 sm:$0xff]  }
 0x1c0   :  { %4500 = vmatprep.subr.bf16.mxu0 %v6215_v49  ;;  %4542 = vmatpush1.bf16.msra.mxu1 %v6228_v50  ;;  %v6275_v49 = vld [vmem:[%s8345_s3 + $0x844] ss:$12 sps:$4 sm:$0xff]  }
 0x1c1   :  { %4543 = vmatprep.subr.bf16.mxu1 %v6236_v41  ;;  %v6255_v41 = vld [vmem:[%s8345_s3 + $0x6c0] ss:$12 sps:$4 sm:$0xff]  }
 0x1c2   :  { %v2201_v55 = vpop.f32.mrf.mxu0 }
 0x1c3   :  { %4501 = vmatpush2.bf16.msra.mxu0 %v6213_v33  ;;  %v2202_v44 = vadd.f32 %v2201_v55, %v358_v32  ;;  %v6266_v55 = vld [vmem:[%s8345_s3 + $0x158] ss:$12 sps:$4 sm:$0xff]  }
 0x1c4   :  { %v2203_v11 = vpop.f32.mrf.mxu0  ;;  %4502 = vmatprep.subr.bf16.mxu0 %v6221_v2  ;;  %4544 = vmatpush2.bf16.msra.mxu1 %v6234_v52  ;;  %v6261_v2 = vld [vmem:[%s8345_s3 + $0x170] ss:$12 sps:$4 sm:$0xff]   ;;  %v6273_v52 = vld [vmem:[%s8345_s3 + $0x840] ss:$12 sps:$4 sm:$0xff]  }
 0x1c5   :  { %v2204_v61 = vadd.f32 %v2203_v11, %v362_v53  ;;  %4545 = vmatprep.subr.bf16.mxu1 %v6242_v42  ;;  %v2245_v50 = vadd.f32 %v7909_v51, %v2202_v44  ;;  %v6278_v51 = vld [vmem:[%s8345_s3 + $0x2f0] ss:$12 sps:$4 sm:$0xff]   ;;  %v366_v11 = vrot.slane %v7917_v13, %v7520_v35  ;;  %v6287_v44 = vld [vmem:[%s8345_s3 + $0xe0] ss:$12 sps:$4 sm:$0xff]  }
 0x1c6   :  { %v2205_v60 = vpop.f32.mrf.mxu0  ;;  %v6262_v42 = vld [vmem:[%s8345_s3 + $0xb0] ss:$12 sps:$4 sm:$0xff]  }
 0x1c7   :  { %4503 = vmatpush2.bf16.msra.mxu0 %v6219_v56  ;;  %v2247_v24 = vadd.f32 %v2246_v6, %v2204_v61  ;;  %v2206_v38 = vadd.f32 %v2205_v60, %v358_v32  ;;  %v370_v56 = vrot.slane %v7917_v13, %v337_v23  ;;  %v6267_v61 = vld [vmem:[%s8345_s3 + $0x98] ss:$12 sps:$4 sm:$0xff]  }
 0x1c8   :  { %v2207_v3 = vpop.f32.mrf.mxu0  ;;  %4504 = vmatprep.subr.bf16.mxu0 %v6227_v59  ;;  %4546 = vmatpush2.bf16.msra.mxu1 %v6240_v34 }
 0x1c9   :  { %v2208_v9 = vadd.f32 %v2207_v3, %v362_v53  ;;  %4547 = vmatprep.subr.bf16.mxu1 %v6248_v0  ;;  %v2348_v19 = vmax.f32 %v2247_v24, 0.0  ;;  %v2249_v46 = vadd.f32 %v2248_v54, %v2206_v38  ;;  %v2347_v53 = vmax.f32 %v2245_v50, 0.0  ;;  %v6283_v38 = vld [vmem:[%s8345_s3 + $0xf8] ss:$12 sps:$4 sm:$0xff]   ;;  %v6294_v50 = vld [vmem:[%s8345_s3 + $0x290] ss:$12 sps:$4 sm:$0xff]  }
 0x1cb   :  { %v2251_v15 = vadd.f32 %v2250_v14, %v2208_v9  ;;  %4505 = vmatpush2.bf16.msra.mxu0 %v6225_v62  ;;  %v2359_v33 = vmax.f32 %v2249_v46, 0.0  ;;  %v6290_v46 = vld [vmem:[%s8345_s3 + $0x2a8] ss:$12 sps:$4 sm:$0xff]  }
 0x1cc   :  { %4506 = vmatprep.subr.bf16.mxu0 %v6233_v4  ;;  %4548 = vmatpush2.bf16.msra.mxu1 %v6246_v7  ;;  %v6276_v7 = vld [vmem:[%s8345_s3 + $0x128] ss:$12 sps:$4 sm:$0xff]  }
 0x1cd   :  { %v2360_v21 = vmax.f32 %v2251_v15, 0.0  ;;  %4549 = vmatprep.subr.bf16.mxu1 %v6254_v10  ;;  %v8023_v6 = vpack.c.bf16 %v2359_v33, %v2347_v53  ;;  %v6295_v33 = vld [vmem:[%s8345_s3 + $0x1d0] ss:$12 sps:$4 sm:$0xff]   ;;  %v6299_v53 = vld [vmem:[%s8345_s3 + $0x1b8] ss:$12 sps:$4 sm:$0xff]  }
 0x1cf   :  { %4507 = vmatpush2.bf16.msra.mxu0 %v6231_v16  ;;  %v7966_v26 = vpack.c.bf16 %v2360_v21, %v2348_v19  ;;  %v6279_v19 = vld [vmem:[%s8345_s3 + $0x110] ss:$12 sps:$4 sm:$0xff]  }
 0x1d0   :  { %4508 = vmatprep.subr.bf16.mxu0 %v6239_v17  ;;  %4550 = vmatpush2.bf16.msra.mxu1 %v6252_v18  ;;  %v6277_v17 = vld [vmem:[%s8345_s3 + $0x68] ss:$12 sps:$4 sm:$0xff]  }
 0x1d1   :  { %4516 = vmatprep.mubr.bf16.mxu0 %v7966_v26  ;;  %4551 = vmatprep.subr.bf16.mxu1 %v6260_v22 }
 0x1d3   :  { %4509 = vmatpush2.bf16.msra.mxu0 %v6237_v27 }
 0x1d4   :  { %4510 = vmatprep.subr.bf16.mxu0 %v6245_v28  ;;  %4552 = vmatpush2.bf16.msra.mxu1 %v6258_v30  ;;  %v6280_v30 = vld [vmem:[%s8345_s3 + $0x230] ss:$12 sps:$4 sm:$0xff]  }
 0x1d5   :  { %4553 = vmatprep.subr.bf16.mxu1 %v6265_v31  ;;  %v6281_v31 = vld [vmem:[%s8345_s3 + $0x50] ss:$12 sps:$4 sm:$0xff]  }
 0x1d7   :  { %4511 = vmatpush2.bf16.msra.mxu0 %v6243_v36  ;;  %v6282_v36 = vld [vmem:[%s8345_s3 + $0x2d8] ss:$12 sps:$4 sm:$0xff]  }
 0x1d8   :  { %4512 = vmatprep.subr.bf16.mxu0 %v6251_v39  ;;  %4554 = vmatpush2.bf16.msra.mxu1 %v6263_v37  ;;  %v6284_v39 = vld [vmem:[%s8345_s3 + $0x218] ss:$12 sps:$4 sm:$0xff]  }
 0x1d9   :  { %4555 = vmatprep.subr.bf16.mxu1 %v6270_v43  ;;  %v6285_v37 = vld [vmem:[%s8345_s3 + $0x38] ss:$12 sps:$4 sm:$0xff]   ;;  %v6286_v43 = vld [vmem:[%s8345_s3 + $0x2c0] ss:$12 sps:$4 sm:$0xff]  }
 0x1db   :  { %4513 = vmatpush2.bf16.msra.mxu0 %v6249_v45  ;;  %v6288_v45 = vld [vmem:[%s8345_s3 + $0x200] ss:$12 sps:$4 sm:$0xff]  }
 0x1dc   :  { %4514 = vmatprep.subr.bf16.mxu0 %v6257_v47  ;;  %4556 = vmatpush2.bf16.msra.mxu1 %v6268_v48  ;;  %v6291_v47 = vld [vmem:[%s8345_s3 + $0xc8] ss:$12 sps:$4 sm:$0xff]  }
 0x1dd   :  { %4557 = vmatprep.subr.bf16.mxu1 %v6275_v49  ;;  %v6292_v48 = vld [vmem:[%s8345_s3 + $0x1e8] ss:$12 sps:$4 sm:$0xff]  }
 0x1de   :  { %v6293_v49 = vld [vmem:[%s8345_s3 + $0x8] ss:$12 sps:$4 sm:$0xff]  }
 0x1df   :  { %4515 = vmatpush2.bf16.msra.mxu0 %v6255_v41  ;;  %v6296_v41 = vld [vmem:[%s8345_s3 + $0x470] ss:$12 sps:$4 sm:$0xff]  }
 0x1e0   :  { %5414 = vmatprep.subr.bf16.mxu0 %v6261_v2  ;;  %4558 = vmatpush2.bf16.msra.mxu1 %v6273_v52  ;;  %v6297_v2 = vld [vmem:[%s8345_s3 + $0x3b0] ss:$12 sps:$4 sm:$0xff]   ;;  %v6298_v52 = vld [vmem:[%s8345_s3 + $0x278] ss:$12 sps:$4 sm:$0xff]  }
 0x1e1   :  { %5436 = vmatprep.subr.bf16.mxu1 %v6278_v51  ;;  %v6300_v51 = vld [vmem:[%s8345_s3 + $0x458] ss:$12 sps:$4 sm:$0xff]  }
 0x1e2   :  { %v2330_v34 = vpop.f32.mrf.mxu0  ;;  %4517 = vmatmul.mubr.bf16.vlgmr.msra.gmra.mxu0 %v8023_v6 }
 0x1e3   :  { %v2287_v59 = vpop.f32.mrf.mxu1  ;;  %5415 = vmatpush3.bf16.msra.mxu0 %v6262_v42  ;;  %4602 = vmatprep.mubr.bf16.mxu0 %v7368_v29  ;;  %v6272_v29 = vld [vmem:[%s8345_s3 + $0x80] ss:$12 sps:$4 sm:$0xff]   ;;  %v6301_v42 = vld [vmem:[%s8345_s3 + $0x398] ss:$12 sps:$4 sm:$0xff]  }
 0x1e4   :  { %v2332_v54 = vpop.f32.mrf.mxu0  ;;  %5416 = vmatprep.subr.bf16.mxu0 %v6266_v55  ;;  %v2288_v13 = vadd.f32 %v2287_v59, %v366_v11  ;;  %v6302_v55 = vld [vmem:[%s8345_s3 + $0x260] ss:$12 sps:$4 sm:$0xff]   ;;  %v6308_v59 = vld [vmem:[%s8345_s3 + $0x428] ss:$12 sps:$4 sm:$0xff]  }
 0x1e5   :  { %v2289_v0 = vpop.f32.mrf.mxu1 }
 0x1e6   :  { %v2290_v23 = vadd.f32 %v2289_v0, %v370_v56  ;;  %v2334_v62 = vpop.f32.mrf.mxu0  ;;  %v2331_v14 = vadd.f32 %v2330_v34, %v2288_v13  ;;  %v6307_v34 = vld [vmem:[%s8345_s3 + $0x188] ss:$12 sps:$4 sm:$0xff]   ;;  %v6310_v0 = vld [vmem:[%s8345_s3 + $0x5f0] ss:$12 sps:$4 sm:$0xff]   ;;  %v6314_v13 = vld [vmem:[%s8345_s3 + $0x5d8] ss:$12 sps:$4 sm:$0xff]  }
 0x1e7   :  { %v2291_v60 = vpop.f32.mrf.mxu1  ;;  %5417 = vmatpush3.bf16.msra.mxu0 %v6267_v61  ;;  %v6309_v61 = vld [vmem:[%s8345_s3 + $0x368] ss:$12 sps:$4 sm:$0xff]  }
 0x1e8   :  { %v2292_v3 = vadd.f32 %v2291_v60, %v366_v11  ;;  %5418 = vmatprep.subr.bf16.mxu0 %v6271_v20  ;;  %v2333_v24 = vadd.f32 %v2332_v54, %v2290_v23  ;;  %v2336_v15 = vpop.f32.mrf.mxu0  ;;  %v2349_v27 = vmax.f32 %v2331_v14, 0.0  ;;  %v6306_v11 = vld [vmem:[%s8345_s3 + $0x248] ss:$12 sps:$4 sm:$0xff]   ;;  %v6311_v54 = vld [vmem:[%s8345_s3 + $0x410] ss:$12 sps:$4 sm:$0xff]  }
 0x1e9   :  { %v2293_v4 = vpop.f32.mrf.mxu1  ;;  %v6312_v20 = vld [vmem:[%s8345_s3 + $0x530] ss:$12 sps:$4 sm:$0xff]   ;;  %v6315_v60 = vld [vmem:[%s8345_s3 + $0x3f8] ss:$12 sps:$4 sm:$0xff]  }
 0x1ea   :  { %v2335_v9 = vadd.f32 %v2334_v62, %v2292_v3  ;;  %v2294_v10 = vadd.f32 %v2293_v4, %v370_v56  ;;  %v2350_v21 = vmax.f32 %v2333_v24, 0.0  ;;  %v6303_v56 = vld [vmem:[%s8345_s3 + $0x1a0] ss:$12 sps:$4 sm:$0xff]   ;;  %v6313_v23 = vld [vmem:[%s8345_s3 + $0x350] ss:$12 sps:$4 sm:$0xff]  }
 0x1eb   :  { %5419 = vmatpush3.bf16.msra.mxu0 %v6272_v29  ;;  %v6316_v62 = vld [vmem:[%s8345_s3 + $0x518] ss:$12 sps:$4 sm:$0xff]   ;;  %v6318_v29 = vld [vmem:[%s8345_s3 + $0x5c0] ss:$12 sps:$4 sm:$0xff]   ;;  %v6323_v24 = vld [vmem:[%s8345_s3 + $0x3c8] ss:$12 sps:$4 sm:$0xff]  }
 0x1ec   :  { %v2337_v16 = vadd.f32 %v2336_v15, %v2294_v10  ;;  %v2361_v18 = vmax.f32 %v2335_v9, 0.0  ;;  %5420 = vmatprep.subr.bf16.mxu0 %v6276_v7  ;;  %v6317_v3 = vld [vmem:[%s8345_s3 + $0x338] ss:$12 sps:$4 sm:$0xff]   ;;  %v6321_v4 = vld [vmem:[%s8345_s3 + $0x320] ss:$12 sps:$4 sm:$0xff]  }
 0x1ed   :  { %v6322_v7 = vld [vmem:[%s8345_s3 + $0x5a8] ss:$12 sps:$4 sm:$0xff]   ;;  %v6326_v14 = vld [vmem:[%s8345_s3 + $0x590] ss:$12 sps:$4 sm:$0xff]  }
 0x1ee   :  { %v2362_v22 = vmax.f32 %v2337_v16, 0.0  ;;  %v8061_v32 = vpack.c.bf16 %v2361_v18, %v2349_v27  ;;  %v6324_v9 = vld [vmem:[%s8345_s3 + $0x4e8] ss:$12 sps:$4 sm:$0xff]   ;;  %v6328_v15 = vld [vmem:[%s8345_s3 + $0x770] ss:$12 sps:$4 sm:$0xff]  }
 0x1ef   :  { %5421 = vmatpush3.bf16.msra.mxu0 %v6277_v17  ;;  %v6325_v10 = vld [vmem:[%s8345_s3 + $0x308] ss:$12 sps:$4 sm:$0xff]   ;;  %v6327_v16 = vld [vmem:[%s8345_s3 + $0x4d0] ss:$12 sps:$4 sm:$0xff]   ;;  %v6330_v18 = vld [vmem:[%s8345_s3 + $0x578] ss:$12 sps:$4 sm:$0xff]  }
 0x1f0   :  { %v8053_v28 = vpack.c.bf16 %v2362_v22, %v2350_v21  ;;  %5422 = vmatprep.subr.bf16.mxu0 %v6279_v19  ;;  %v6329_v17 = vld [vmem:[%s8345_s3 + $0x6b0] ss:$12 sps:$4 sm:$0xff]   ;;  %v6332_v19 = vld [vmem:[%s8345_s3 + $0x758] ss:$12 sps:$4 sm:$0xff]   ;;  %v6334_v27 = vld [vmem:[%s8345_s3 + $0x560] ss:$12 sps:$4 sm:$0xff]  }
 0x1f1   :  { %v6331_v21 = vld [vmem:[%s8345_s3 + $0x4b8] ss:$12 sps:$4 sm:$0xff]  }
 0x1f2   :  { %4559 = vmatprep.mubr.bf16.mxu1 %v8053_v28  ;;  %v6333_v22 = vld [vmem:[%s8345_s3 + $0x698] ss:$12 sps:$4 sm:$0xff]  }
 0x1f3   :  { %4560 = vmatmul.mubr.bf16.vlgmr.msra.gmra.mxu1 %v8061_v32  ;;  %5423 = vmatpush3.bf16.msra.mxu0 %v6281_v31  ;;  %v6338_v31 = vld [vmem:[%s8345_s3 + $0x548] ss:$12 sps:$4 sm:$0xff]  }
 0x1f4   :  { %5437 = vmatpush3.bf16.msra.mxu1 %v6280_v30  ;;  %4643 = vmatprep.mubr.bf16.mxu1 %v7423_v57  ;;  %v6289_v57 = vld [vmem:[%s8345_s3 + $0x20] ss:$12 sps:$4 sm:$0xff]  }
 0x1f5   :  { %5438 = vmatprep.subr.bf16.mxu1 %v6282_v36  ;;  %5424 = vmatprep.subr.bf16.mxu0 %v6283_v38  ;;  %v6335_v30 = vld [vmem:[%s8345_s3 + $0x4a0] ss:$12 sps:$4 sm:$0xff]   ;;  %v6340_v36 = vld [vmem:[%s8345_s3 + $0x728] ss:$12 sps:$4 sm:$0xff]  }
 0x1f6   :  { %v6339_v38 = vld [vmem:[%s8345_s3 + $0x488] ss:$12 sps:$4 sm:$0xff]  }
 0x1f7   :  { %5425 = vmatpush3.bf16.msra.mxu0 %v6285_v37  ;;  %v6342_v37 = vld [vmem:[%s8345_s3 + $0x8f0] ss:$12 sps:$4 sm:$0xff]  }
 0x1f8   :  { %5439 = vmatpush3.bf16.msra.mxu1 %v6284_v39  ;;  %5426 = vmatprep.subr.bf16.mxu0 %v6287_v44  ;;  %v6341_v39 = vld [vmem:[%s8345_s3 + $0x668] ss:$12 sps:$4 sm:$0xff]   ;;  %v6344_v44 = vld [vmem:[%s8345_s3 + $0x830] ss:$12 sps:$4 sm:$0xff]  }
 0x1f9   :  { %5440 = vmatprep.subr.bf16.mxu1 %v6286_v43  ;;  %v6343_v43 = vld [vmem:[%s8345_s3 + $0x710] ss:$12 sps:$4 sm:$0xff]  }
 0x1fb   :  { %5427 = vmatpush3.bf16.msra.mxu0 %v6289_v57  ;;  %v6346_v57 = vld [vmem:[%s8345_s3 + $0x8d8] ss:$12 sps:$4 sm:$0xff]  }
 0x1fc   :  { %5441 = vmatpush3.bf16.msra.mxu1 %v6288_v45  ;;  %5428 = vmatprep.subr.bf16.mxu0 %v6291_v47  ;;  %v6345_v45 = vld [vmem:[%s8345_s3 + $0x650] ss:$12 sps:$4 sm:$0xff]   ;;  %v6348_v47 = vld [vmem:[%s8345_s3 + $0x818] ss:$12 sps:$4 sm:$0xff]  }
 0x1fd   :  { %5442 = vmatprep.subr.bf16.mxu1 %v6290_v46  ;;  %v6347_v46 = vld [vmem:[%s8345_s3 + $0x6f8] ss:$12 sps:$4 sm:$0xff]  }
 0x1ff   :  { %5429 = vmatpush3.bf16.msra.mxu0 %v6293_v49  ;;  %v6350_v49 = vld [vmem:[%s8345_s3 + $0x8c0] ss:$12 sps:$4 sm:$0xff]  }
 0x200   :  { %5443 = vmatpush3.bf16.msra.mxu1 %v6292_v48  ;;  %5458 = vmatprep.subr.bf16.mxu0 %v6296_v41  ;;  %v6349_v48 = vld [vmem:[%s8345_s3 + $0x638] ss:$12 sps:$4 sm:$0xff]   ;;  %v6354_v41 = vld [vmem:[%s8345_s3 + $0x8a8] ss:$12 sps:$4 sm:$0xff]  }
 0x201   :  { %5444 = vmatprep.subr.bf16.mxu1 %v6294_v50  ;;  %v6353_v50 = vld [vmem:[%s8345_s3 + $0x620] ss:$12 sps:$4 sm:$0xff]  }
 0x202   :  { %4603 = vmatmul.mubr.bf16.vlgmr.msra.gmra.mxu0 %v7303_v58  ;;  %v6304_v58 = vld [vmem:[%s8345_s3 + $0x440] ss:$12 sps:$4 sm:$0xff]  }
 0x203   :  { %5459 = vmatpush3.bf16.msra.mxu0 %v6297_v2  ;;  %4684 = vmatprep.mubr.bf16.mxu0 %v7647_v40  ;;  %v6305_v40 = vld [vmem:[%s8345_s3 + $0x380] ss:$12 sps:$4 sm:$0xff]   ;;  %v6356_v2 = vld [vmem:[%s8345_s3 + $0x7e8] ss:$12 sps:$4 sm:$0xff]  }
 0x204   :  { %5445 = vmatpush3.bf16.msra.mxu1 %v6295_v33  ;;  %5460 = vmatprep.subr.bf16.mxu0 %v6300_v51  ;;  %v6355_v33 = vld [vmem:[%s8345_s3 + $0x6c8] ss:$12 sps:$4 sm:$0xff]   ;;  %v6358_v51 = vld [vmem:[%s8345_s3 + $0x890] ss:$12 sps:$4 sm:$0xff]  }
 0x205   :  { %5446 = vmatprep.subr.bf16.mxu1 %v6298_v52  ;;  %v6357_v52 = vld [vmem:[%s8345_s3 + $0x608] ss:$12 sps:$4 sm:$0xff]  }
 0x207   :  { %5461 = vmatpush3.bf16.msra.mxu0 %v6301_v42  ;;  %v6360_v42 = vld [vmem:[%s8345_s3 + $0x878] ss:$12 sps:$4 sm:$0xff]  }
 0x208   :  { %5447 = vmatpush3.bf16.msra.mxu1 %v6299_v53  ;;  %5462 = vmatprep.subr.bf16.mxu0 %v6304_v58  ;;  %v6359_v53 = vld [vmem:[%s8345_s3 + $0x7d0] ss:$12 sps:$4 sm:$0xff]   ;;  %v6362_v58 = vld [vmem:[%s8345_s3 + $0x860] ss:$12 sps:$4 sm:$0xff]  }
 0x209   :  { %5448 = vmatprep.subr.bf16.mxu1 %v6302_v55  ;;  %v6361_v55 = vld [vmem:[%s8345_s3 + $0x7b8] ss:$12 sps:$4 sm:$0xff]  }
 0x20b   :  { %5463 = vmatpush3.bf16.msra.mxu0 %v6305_v40  ;;  %v6365_v40 = vld [vmem:[%s8345_s3 + $0x788] ss:$12 sps:$4 sm:$0xff]  }
 0x20c   :  { %5449 = vmatpush3.bf16.msra.mxu1 %v6303_v56  ;;  %5464 = vmatprep.subr.bf16.mxu0 %v6308_v59  ;;  %v6363_v56 = vld [vmem:[%s8345_s3 + $0x7a0] ss:$12 sps:$4 sm:$0xff]  }
 0x20d   :  { %5450 = vmatprep.subr.bf16.mxu1 %v6306_v11 }
 0x20f   :  { %5465 = vmatpush3.bf16.msra.mxu0 %v6309_v61 }
 0x210   :  { %5451 = vmatpush3.bf16.msra.mxu1 %v6307_v34  ;;  %5466 = vmatprep.subr.bf16.mxu0 %v6311_v54 }
 0x211   :  { %5480 = vmatprep.subr.bf16.mxu1 %v6310_v0 }
 0x213   :  { %4644 = vmatmul.mubr.bf16.vlgmr.msra.gmra.mxu1 %v7591_v1  ;;  %5467 = vmatpush3.bf16.msra.mxu0 %v6313_v23  ;;  %v6319_v1 = vld [vmem:[%s8345_s3 + $0x3e0] ss:$12 sps:$4 sm:$0xff]  }
 0x214   :  { %5481 = vmatpush3.bf16.msra.mxu1 %v6312_v20  ;;  %4725 = vmatprep.mubr.bf16.mxu1 %v7756_v12  ;;  %v6320_v12 = vld [vmem:[%s8345_s3 + $0x500] ss:$12 sps:$4 sm:$0xff]  }
 0x215   :  { %5482 = vmatprep.subr.bf16.mxu1 %v6314_v13  ;;  %5468 = vmatprep.subr.bf16.mxu0 %v6315_v60  ;;  %v8331_v23 = vld [vmem:[%s8346_s4] sm:$0x7] }
 0x217   :  { %5469 = vmatpush3.bf16.msra.mxu0 %v6317_v3 }
 0x218   :  { %5483 = vmatpush3.bf16.msra.mxu1 %v6316_v62  ;;  %5470 = vmatprep.subr.bf16.mxu0 %v6319_v1  ;;  %v2764_v62 = vrot.slane %v8331_v23, %v7243_v25 }
 0x219   :  { %5484 = vmatprep.subr.bf16.mxu1 %v6318_v29 }
 0x21b   :  { %5471 = vmatpush3.bf16.msra.mxu0 %v6321_v4 }
 0x21c   :  { %5485 = vmatpush3.bf16.msra.mxu1 %v6320_v12  ;;  %5472 = vmatprep.subr.bf16.mxu0 %v6323_v24 }
 0x21d   :  { %5486 = vmatprep.subr.bf16.mxu1 %v6322_v7 }
 0x21f   :  { %5473 = vmatpush3.bf16.msra.mxu0 %v6325_v10 }
 0x220   :  { %5487 = vmatpush3.bf16.msra.mxu1 %v6324_v9  ;;  %5502 = vmatprep.subr.bf16.mxu0 %v6328_v15 }
 0x221   :  { %5488 = vmatprep.subr.bf16.mxu1 %v6326_v14 }
 0x222   :  { %4685 = vmatmul.mubr.bf16.vlgmr.msra.gmra.mxu0 %v7810_v5  ;;  %v6336_v5 = vld [vmem:[%s8345_s3 + $0x740] ss:$12 sps:$4 sm:$0xff]   ;;  %v4346_v11 = vpop.f32.mrf.mxu0 }
 0x223   :  { %5503 = vmatpush3.bf16.msra.mxu0 %v6329_v17  ;;  %4766 = vmatprep.mubr.bf16.mxu0 %v7966_v26  ;;  %v6337_v26 = vld [vmem:[%s8345_s3 + $0x680] ss:$12 sps:$4 sm:$0xff]   ;;  %v4389_v61 = vpop.f32.mrf.mxu1  ;;  %v4347_v12 = vadd.f32 %v4346_v11, %v2764_v62 }
 0x224   :  { %5489 = vmatpush3.bf16.msra.mxu1 %v6327_v16  ;;  %5504 = vmatprep.subr.bf16.mxu0 %v6332_v19  ;;  %v4348_v59 = vpop.f32.mrf.mxu0 }
 0x225   :  { %5490 = vmatprep.subr.bf16.mxu1 %v6330_v18  ;;  %v4391_v54 = vpop.f32.mrf.mxu1  ;;  %v4390_v10 = vadd.f32 %v4389_v61, %v4347_v12  ;;  %v2772_v61 = vrot.slane %v8331_v23, %v7520_v35 }
 0x226   :  { %v4350_v34 = vpop.f32.mrf.mxu0 }
 0x227   :  { %5505 = vmatpush3.bf16.msra.mxu0 %v6333_v22  ;;  %v4393_v13 = vpop.f32.mrf.mxu1  ;;  %v4351_v14 = vadd.f32 %v4350_v34, %v2764_v62 }
 0x228   :  { %5491 = vmatpush3.bf16.msra.mxu1 %v6331_v21  ;;  %5506 = vmatprep.subr.bf16.mxu0 %v6336_v5  ;;  %v4352_v0 = vpop.f32.mrf.mxu0 }
 0x229   :  { %5492 = vmatprep.subr.bf16.mxu1 %v6334_v27  ;;  %v4395_v3 = vpop.f32.mrf.mxu1  ;;  %v4394_v21 = vadd.f32 %v4393_v13, %v4351_v14 }
 0x22b   :  { %5507 = vmatpush3.bf16.msra.mxu0 %v6337_v26 }
 0x22c   :  { %5493 = vmatpush3.bf16.msra.mxu1 %v6335_v30  ;;  %5508 = vmatprep.subr.bf16.mxu0 %v6340_v36 }
 0x22d   :  { %5494 = vmatprep.subr.bf16.mxu1 %v6338_v31 }
 0x22f   :  { %5509 = vmatpush3.bf16.msra.mxu0 %v6341_v39 }
 0x230   :  { %5495 = vmatpush3.bf16.msra.mxu1 %v6339_v38  ;;  %5510 = vmatprep.subr.bf16.mxu0 %v6343_v43 }
 0x231   :  { %5524 = vmatprep.subr.bf16.mxu1 %v6342_v37 }
 0x233   :  { %4726 = vmatmul.mubr.bf16.vlgmr.msra.gmra.mxu1 %v7818_v8  ;;  %5511 = vmatpush3.bf16.msra.mxu0 %v6345_v45  ;;  %v6351_v8 = vld [vmem:[%s8345_s3 + $0x6e0] ss:$12 sps:$4 sm:$0xff]  }
 0x234   :  { %5525 = vmatpush3.bf16.msra.mxu1 %v6344_v44  ;;  %4807 = vmatprep.mubr.bf16.mxu1 %v8053_v28  ;;  %v6352_v28 = vld [vmem:[%s8345_s3 + $0x800] ss:$12 sps:$4 sm:$0xff]  }
 0x235   :  { %5526 = vmatprep.subr.bf16.mxu1 %v6346_v57  ;;  %5512 = vmatprep.subr.bf16.mxu0 %v6347_v46 }
 0x237   :  { %5513 = vmatpush3.bf16.msra.mxu0 %v6349_v48 }
 0x238   :  { %5527 = vmatpush3.bf16.msra.mxu1 %v6348_v47  ;;  %5514 = vmatprep.subr.bf16.mxu0 %v6351_v8 }
 0x239   :  { %5528 = vmatprep.subr.bf16.mxu1 %v6350_v49 }
 0x23b   :  { %5515 = vmatpush3.bf16.msra.mxu0 %v6353_v50 }
 0x23c   :  { %5529 = vmatpush3.bf16.msra.mxu1 %v6352_v28  ;;  %5516 = vmatprep.subr.bf16.mxu0 %v6355_v33 }
 0x23d   :  { %5530 = vmatprep.subr.bf16.mxu1 %v6354_v41 }
 0x23f   :  { %5517 = vmatpush3.bf16.msra.mxu0 %v6357_v52 }
 0x240   :  { %5531 = vmatpush3.bf16.msra.mxu1 %v6356_v2 }
 0x241   :  { %5532 = vmatprep.subr.bf16.mxu1 %v6358_v51 }
 0x242   :  { %4767 = vmatmul.mubr.bf16.vlgmr.msra.gmra.mxu0 %v8023_v6  ;;  %v6364_v6 = vld [vmem:[%s8345_s3 + $0x848] ss:$12 sps:$4 sm:$0xff]   ;;  %s6390_s3 = smov [#allocation2]  }
 0x243   :  { %s4827_s4 = sshll.u32 %s6390_s3, 4  ;;  %s4828_s4 = int_to_ptr.vmem [resolvable:$true] %s4827_s4 }
 0x244   :  { %5533 = vmatpush3.bf16.msra.mxu1 %v6359_v53  ;;  %s6367_s1 = scalar_lea.vmem %s4828_s4, 768  ;;  %p6372_p1 = scmp.lt.s32.totalorder %s4828_s4, %s4828_s4 }
 0x245   :  { %5534 = vmatprep.subr.bf16.mxu1 %v6360_v42  ;;  %p6368_p0 = scmp.ne.s32.totalorder %s4828_s4, %s6367_s1  ;;  %p6373_p2 = scmp.lt.s32.totalorder %s6367_s1, %s6367_s1 }
 0x247   :  { %p6374_p3 = por %p6373_p2, %p6372_p1 }
 0x248   :  { %5535 = vmatpush3.bf16.msra.mxu1 %v6361_v55 }
 0x249   :  { %5536 = vmatprep.subr.bf16.mxu1 %v6362_v58  ;;  %p6375_p4 = pnand %p6374_p3, %p6368_p0 }
 0x24c   :  { %5537 = vmatpush3.bf16.msra.mxu1 %v6363_v56 }
 0x24d   :  { %5538 = vmatprep.subr.bf16.mxu1 %v6364_v6 }
 0x250   :  { %5539 = vmatpush3.bf16.msra.mxu1 %v6365_v40 }
 0x253   :  { %4808 = vmatmul.mubr.bf16.vlgmr.msra.gmra.mxu1 %v8061_v32  ;;  %v2768_v32 = vrot.slane %v8331_v23, %v7318_v63 }
 0x255   :  { %v4349_v7 = vadd.f32 %v4348_v59, %v2768_v32  ;;  %v4353_v16 = vadd.f32 %v4352_v0, %v2768_v32 }
 0x257   :  { %v4392_v15 = vadd.f32 %v4391_v54, %v4349_v7  ;;  %v4396_v22 = vadd.f32 %v4395_v3, %v4353_v16 }
 0x262   :  { %v4432_v20 = vpop.f32.mrf.mxu0 }
 0x263   :  { %v4475_v1 = vpop.f32.mrf.mxu1  ;;  %v4433_v17 = vadd.f32 %v4432_v20, %v4390_v10 }
 0x264   :  { %v4434_v60 = vpop.f32.mrf.mxu0 }
 0x265   :  { %v4477_v24 = vpop.f32.mrf.mxu1  ;;  %v4435_v25 = vadd.f32 %v4434_v60, %v4392_v15  ;;  %v4476_v27 = vadd.f32 %v4475_v1, %v4433_v17 }
 0x266   :  { %v4436_v29 = vpop.f32.mrf.mxu0 }
 0x267   :  { %v4479_v18 = vpop.f32.mrf.mxu1  ;;  %v4437_v5 = vadd.f32 %v4436_v29, %v4394_v21  ;;  %v4478_v26 = vadd.f32 %v4477_v24, %v4435_v25 }
 0x268   :  { %v4438_v4 = vpop.f32.mrf.mxu0 }
 0x269   :  { %v4481_v30 = vpop.f32.mrf.mxu1  ;;  %v4439_v31 = vadd.f32 %v4438_v4, %v4396_v22  ;;  %v4480_v39 = vadd.f32 %v4479_v18, %v4437_v5 }
 0x26b   :  { %v4482_v57 = vadd.f32 %v4481_v30, %v4439_v31 }
 0x2a2   :  { %v4518_v9 = vpop.f32.mrf.mxu0 }
 0x2a3   :  { %v4519_v36 = vadd.f32 %v4518_v9, %v4476_v27 }
 0x2a4   :  { %v4520_v19 = vpop.f32.mrf.mxu0 }
 0x2a5   :  { %v4521_v37 = vadd.f32 %v4520_v19, %v4478_v26 }
 0x2a6   :  { %v4522_v63 = vpop.f32.mrf.mxu0 }
 0x2a7   :  { %v4523_v46 = vadd.f32 %v4522_v63, %v4480_v39 }
 0x2a8   :  { %v4524_v44 = vpop.f32.mrf.mxu0 }
 0x2a9   :  { %v4525_v49 = vadd.f32 %v4524_v44, %v4482_v57 }
 0x2b3   :  { %v4561_v38 = vpop.f32.mrf.mxu1 }
 0x2b4   :  { %v4562_v43 = vadd.f32 %v4561_v38, %v4519_v36 }
 0x2b5   :  { %v4563_v45 = vpop.f32.mrf.mxu1 }
 0x2b6   :  { %4816 = vst [vmem:[#allocation2] sm:$0xff] %v4562_v43  ;;  %v4564_v47 = vadd.f32 %v4563_v45, %v4521_v37 }
 0x2b7   :  { %v4565_v48 = vpop.f32.mrf.mxu1 }
 0x2b8   :  { %4817 = vst [vmem:[#allocation2 + $0x8] sm:$0xff] %v4564_v47  ;;  %v4566_v8 = vadd.f32 %v4565_v48, %v4523_v46 }
 0x2b9   :  { %v4567_v28 = vpop.f32.mrf.mxu1 }
 0x2ba   :  { %4819 = vst [vmem:[#allocation2 + $0x18] sm:$0xff] %v4566_v8  ;;  %v4568_v50 = vadd.f32 %v4567_v28, %v4525_v49 }
 0x2bc   :  { %4820 = vst [vmem:[#allocation2 + $0x20] sm:$0xff] %v4568_v50 }
 0x2c2   :  { %v5430_v41 = vpop.f32.mrf.mxu0 }
 0x2c4   :  { %v5431_v33 = vpop.f32.mrf.mxu0 }
 0x2c5   :  { %v5432_v0 = vadd.f32 %v5431_v33, %v5430_v41 }
 0x2c6   :  { %v5433_v2 = vpop.f32.mrf.mxu0 }
 0x2c7   :  { %v4605_v60 = vadd.f32 %v5432_v0, %v2772_v61 }
 0x2c8   :  { %v5434_v52 = vpop.f32.mrf.mxu0 }
 0x2c9   :  { %v5435_v62 = vadd.f32 %v5434_v52, %v5433_v2 }
 0x2cb   :  { %v4608_v7 = vadd.f32 %v5435_v62, %v2772_v61 }
 0x2d3   :  { %v5452_v51 = vpop.f32.mrf.mxu1 }
 0x2d5   :  { %v5453_v42 = vpop.f32.mrf.mxu1 }
 0x2d6   :  { %v5454_v20 = vadd.f32 %v5453_v42, %v5452_v51 }
 0x2d7   :  { %v5455_v58 = vpop.f32.mrf.mxu1 }
 0x2d8   :  { %v4646_v32 = vadd.f32 %v5454_v20, %v4605_v60 }
 0x2d9   :  { %v5456_v6 = vpop.f32.mrf.mxu1 }
 0x2da   :  { %v5457_v1 = vadd.f32 %v5456_v6, %v5455_v58 }
 0x2dc   :  { %v4649_v16 = vadd.f32 %v5457_v1, %v4608_v7 }
 0x2e2   :  { %v5474_v53 = vpop.f32.mrf.mxu0 }
 0x2e4   :  { %v5475_v55 = vpop.f32.mrf.mxu0 }
 0x2e5   :  { %v5476_v3 = vadd.f32 %v5475_v55, %v5474_v53 }
 0x2e6   :  { %v5477_v56 = vpop.f32.mrf.mxu0 }
 0x2e7   :  { %v4687_v24 = vadd.f32 %v5476_v3, %v4646_v32 }
 0x2e8   :  { %v5478_v40 = vpop.f32.mrf.mxu0 }
 0x2e9   :  { %v5479_v9 = vadd.f32 %v5478_v40, %v5477_v56 }
 0x2eb   :  { %v4690_v18 = vadd.f32 %v5479_v9, %v4649_v16 }
 0x2f3   :  { %v5496_v11 = vpop.f32.mrf.mxu1 }
 0x2f5   :  { %v5497_v34 = vpop.f32.mrf.mxu1 }
 0x2f6   :  { %v5498_v12 = vadd.f32 %v5497_v34, %v5496_v11 }
 0x2f7   :  { %v5499_v13 = vpop.f32.mrf.mxu1 }
 0x2f8   :  { %v4728_v35 = vadd.f32 %v5498_v12, %v4687_v24 }
 0x2f9   :  { %v5500_v4 = vpop.f32.mrf.mxu1 }
 0x2fa   :  { %v5501_v23 = vadd.f32 %v5500_v4, %v5499_v13 }
 0x2fc   :  { %v4731_v27 = vadd.f32 %v5501_v23, %v4690_v18 }
 0x302   :  { %v5518_v59 = vpop.f32.mrf.mxu0 }
 0x304   :  { %v5519_v54 = vpop.f32.mrf.mxu0 }
 0x305   :  { %v5520_v10 = vadd.f32 %v5519_v54, %v5518_v59 }
 0x306   :  { %v5521_v29 = vpop.f32.mrf.mxu0 }
 0x307   :  { %v4769_v19 = vadd.f32 %v5520_v10, %v4728_v35 }
 0x308   :  { %v5522_v14 = vpop.f32.mrf.mxu0 }
 0x309   :  { %v5523_v21 = vadd.f32 %v5522_v14, %v5521_v29 }
 0x30b   :  { %v4772_v63 = vadd.f32 %v5523_v21, %v4731_v27 }
 0x313   :  { %v5540_v15 = vpop.f32.mrf.mxu1 }
 0x315   :  { %v5541_v17 = vpop.f32.mrf.mxu1 }
 0x316   :  { %v5542_v25 = vadd.f32 %v5541_v17, %v5540_v15 }
 0x317   :  { %v5543_v22 = vpop.f32.mrf.mxu1 }
 0x318   :  { %v4810_v5 = vadd.f32 %v5542_v25, %v4769_v19 }
 0x319   :  { %v5544_v30 = vpop.f32.mrf.mxu1 }
 0x31a   :  { %4818 = vst [vmem:[#allocation2 + $0x10] sm:$0xff] %v4810_v5  ;;  %v5545_v26 = vadd.f32 %v5544_v30, %v5543_v22 }
 0x31c   :  { %v4813_v31 = vadd.f32 %v5545_v26, %v4772_v63 }
 0x31e   :  { %4821 = vst [vmem:[#allocation2 + $0x28] sm:$0xff] %v4813_v31 }
 0x31f   :  { %6378 = shalt.err (!%p6375_p4)
}
 0x320   :  { %s6391_s21 = smov 384   ;;  %s6392_s22 = smov 24  }
 0x321   :  { %4833 = dma.vmem_to_hbm [thread:$0]  %s4828_s4, 768, %s8347_s5, [#allocation3], %s6391_s21, %s6391_s21, %s6392_s22  }
 0x322   :  { %6387 = dma.done.wait [#allocation3], 768  }
 0x323   :  { %6388 = vsyncadd [#allocation3], 4294966528 }
 0x324   :  { %4837 = vsyncpa [#allocation3], 1 }

</bundles_post_ra>
